<compile_context>
chip_gen: v6e
topology: v6e:2x2x1
jax: 0.10.0
libtpu: 0.0.40
codegen_flags: <defaults>
</compile_context>

<pallas_src>
import functools

import jax
import jax.numpy as jnp
from jax.experimental import pallas as pl
from jax.experimental.pallas import tpu as pltpu

BN_EPS = 1e-5
LRELU_SLOPE = 0.2


def _derive_vmem_budgets():
    """Per-generation scoped-VMEM limit and per-call tile working-set budget."""
    cap = 64 * 1024 * 1024
    try:
        cap = int(getattr(pltpu.get_tpu_info(), "vmem_capacity_bytes", cap))
    except Exception:
        pass
    vmem_limit = min(cap * 3 // 4, 96 * 1024 * 1024)   # 96 MiB on v5e/v6e, 48 MiB on v7x
    tile_budget = min(cap * 2 // 5, 48 * 1024 * 1024)  # leave double-buffer headroom
    return vmem_limit, tile_budget


_VMEM_LIMIT, _TILE_BUDGET = _derive_vmem_budgets()


# --------------------------------------------------------------------------
# Fused conv-block kernel: matmul + BN stats + BN apply + LeakyReLU
# --------------------------------------------------------------------------
def conv_bn_lrelu_kernel(w_ref, p_ref, g_ref, b_ref, o_ref,
                         y_scr, sum_scr, sq_scr, *, true_m):
    """One conv block in a single grid pass over M tiles.

    w_ref   : (C, K)       bf16  conv weight (resident across the grid)
    p_ref   : (K, tile_M)  bf16  im2col patch tile (streamed)
    g_ref   : (C, 1)       f32   BN gamma (resident)
    b_ref   : (C, 1)       f32   BN beta  (resident)
    o_ref   : (C, M_pad)   bf16  final activation (resident; written at last step)
    y_scr   : (C, M_pad)   f32   pre-BN conv output (VMEM scratch, never in HBM)
    sum_scr : (C, 1)       f32   per-channel sum accumulator
    sq_scr  : (C, 1)       f32   per-channel sum-of-squares accumulator
    """
    i = pl.program_id(0)
    tile_m = p_ref.shape[1]

    @pl.when(i == 0)
    def _init():
        sum_scr[...] = jnp.zeros_like(sum_scr)
        sq_scr[...] = jnp.zeros_like(sq_scr)

    # bf16 MXU matmul with f32 accumulation; lane-dense (C, tile_M) result.
    y = jnp.dot(w_ref[...], p_ref[...], preferred_element_type=jnp.float32)
    col = pl.multiple_of(i * tile_m, tile_m)
    y_scr[:, pl.ds(col, tile_m)] = y
    # Last-axis (lane/XLU) reductions; zero-padded M columns contribute 0.
    sum_scr[...] += jnp.sum(y, axis=1, keepdims=True)
    sq_scr[...] += jnp.sum(y * y, axis=1, keepdims=True)

    @pl.when(i == pl.num_programs(0) - 1)
    def _finalize():
        inv_m = 1.0 / true_m                       # true (unpadded) count
        mean = sum_scr[...] * inv_m
        # Biased variance (PyTorch training-mode BN); clamp against f32
        # cancellation so rsqrt never sees a negative value.
        var = jnp.maximum(sq_scr[...] * inv_m - mean * mean, 0.0)
        scale = g_ref[...] * jax.lax.rsqrt(var + BN_EPS)
        shift = b_ref[...] - mean * scale
        z = y_scr[...] * scale + shift
        o_ref[...] = jnp.where(z >= 0.0, z, LRELU_SLOPE * z).astype(o_ref.dtype)


def _fused_conv_bn_lrelu(w_ck, patches_km, gamma, beta, true_m, tile_m):
    c, k = w_ck.shape
    m_pad = patches_km.shape[1]
    grid = (m_pad // tile_m,)
    kernel = functools.partial(conv_bn_lrelu_kernel, true_m=float(true_m))
    return pl.pallas_call(
        kernel,
        out_shape=jax.ShapeDtypeStruct((c, m_pad), jnp.bfloat16),
        grid_spec=pltpu.PrefetchScalarGridSpec(
            num_scalar_prefetch=0,
            grid=grid,
            in_specs=[
                pl.BlockSpec((c, k), lambda i: (0, 0)),        # weight, resident
                pl.BlockSpec((k, tile_m), lambda i: (0, i)),   # patch tile stream
                pl.BlockSpec((c, 1), lambda i: (0, 0)),        # gamma, resident
                pl.BlockSpec((c, 1), lambda i: (0, 0)),        # beta, resident
            ],
            # Full output resident in VMEM across the (arbitrary) grid; written
            # once at the last step, flushed to HBM after the grid ends.
            out_specs=pl.BlockSpec((c, m_pad), lambda i: (0, 0)),
            scratch_shapes=[
                pltpu.VMEM((c, m_pad), jnp.float32),   # y (pre-BN) buffer
                pltpu.VMEM((c, 1), jnp.float32),       # per-channel sum
                pltpu.VMEM((c, 1), jnp.float32),       # per-channel sumsq
            ],
        ),
        compiler_params=pltpu.CompilerParams(
            dimension_semantics=("arbitrary",),  # stats accumulate across M tiles
            vmem_limit_bytes=_VMEM_LIMIT,
        ),
    )(w_ck, patches_km, gamma, beta)


# --------------------------------------------------------------------------
# Plain-JAX glue
# --------------------------------------------------------------------------
def _round_up(x, m):
    return (x + m - 1) // m * m


def _pick_tile_m(k_dim, c_dim, m):
    """Largest multiple-of-128 M tile (<=2048) whose working set fits the budget.

    Resident across the grid: bf16 weight (C,K), bf16 output (C,M_pad), f32 y
    scratch (C,M_pad).  Streamed per step: double-buffered bf16 (K, tile_M)
    patch tile.
    """
    m128 = _round_up(m, 128)
    resident = k_dim * c_dim * 2 + c_dim * m128 * (2 + 4) + 4 * c_dim * 4
    per_col = 2 * (k_dim * 2)                    # x2: double-buffered patches
    t = (_TILE_BUDGET - resident) // per_col
    t = max(128, min(2048, (t // 128) * 128))
    return min(t, m128)


def im2col_cm(x_cnhw, k=4, s=2, p=1):
    """(C,N,H,W) -> patches (K, M); K ordered (kh,kw,cin), M ordered (n,ho,wo)."""
    c, n, h, w = x_cnhw.shape
    xp = jnp.pad(x_cnhw, ((0, 0), (0, 0), (p, p), (p, p)))
    ho = (h + 2 * p - k) // s + 1
    wo = (w + 2 * p - k) // s + 1
    pats = [xp[:, :, i:i + s * ho:s, j:j + s * wo:s]
            for i in range(k) for j in range(k)]     # each (C, N, Ho, Wo)
    pt = jnp.stack(pats, axis=0)                     # (k*k, C, N, Ho, Wo)
    return pt.reshape(k * k * c, n * ho * wo), ho, wo


def conv_weight_to_ck(w_oihw):
    """PyTorch OIHW conv weight -> (Cout, kh*kw*Cin) bf16, matching im2col_cm."""
    co, ci, kh, kw = w_oihw.shape
    return jnp.transpose(w_oihw, (0, 2, 3, 1)).reshape(co, kh * kw * ci).astype(
        jnp.bfloat16)


def conv_block(x_cnhw, w_ck, gamma, beta):
    """x_cnhw: bf16 (C_in, N, H, W) -> bf16 (C_out, N, Ho, Wo)."""
    c_out, k_dim = w_ck.shape
    _, n, _, _ = x_cnhw.shape
    patches, ho, wo = im2col_cm(x_cnhw)            # bf16 throughout (input is bf16)
    m = n * ho * wo
    tile_m = _pick_tile_m(k_dim, c_out, m)
    m_pad = _round_up(m, tile_m)
    # Zero-padded M columns contribute 0 to sum/sumsq; BN stats divide by the
    # true (unpadded) count, so statistics stay exact.
    patches = jnp.pad(patches, ((0, 0), (0, m_pad - m)))

    a = _fused_conv_bn_lrelu(w_ck, patches, gamma, beta, m, tile_m)
    return a[:, :m].reshape(c_out, n, ho, wo)


def init_params(key, in_channels=3, out_conv_channels=64):
    c1 = out_conv_channels // 8
    c2 = out_conv_channels // 4
    c3 = out_conv_channels // 2
    c4 = out_conv_channels
    chans = [(in_channels, c1), (c1, c2), (c2, c3), (c3, c4)]
    keys = jax.random.split(key, 4)
    params = {}
    for idx, ((ci, co), kk) in enumerate(zip(chans, keys), start=1):
        w = 0.02 * jax.random.normal(kk, (co, ci, 4, 4), jnp.float32)
        params[f"conv{idx}_w"] = conv_weight_to_ck(w)
        params[f"bn{idx}_gamma"] = jnp.ones((co, 1), jnp.float32)
        params[f"bn{idx}_beta"] = jnp.zeros((co, 1), jnp.float32)
    return params


@jax.jit
def discriminator_forward(x_nchw, params, lin_w, lin_b):
    # NCHW -> internal channels-first (C, N, H, W) bf16 layout: one transpose +
    # one cast total; all conv blocks stay in this layout.
    x = jnp.transpose(x_nchw, (1, 0, 2, 3)).astype(jnp.bfloat16)
    for idx in range(1, 5):
        x = conv_block(x,
                       params[f"conv{idx}_w"],
                       params[f"bn{idx}_gamma"],
                       params[f"bn{idx}_beta"])
    c4, n, od, _ = x.shape
    # Match PyTorch x.view(-1, C*out_dim*out_dim) on an NCHW tensor.
    flat = jnp.transpose(x, (1, 0, 2, 3)).reshape(n, c4 * od * od).astype(jnp.float32)
    # Final Linear(F->1) + Sigmoid left to XLA on purpose: a few-KFLOP matvec
    # with a lane-width-1 output would be dominated by pallas_call overhead
    # and a fully masked store.
    return jax.nn.sigmoid(flat @ lin_w + lin_b)


if __name__ == "__main__":
    # Small, consistent config: dim=16 -> out_dim = dim/16 = 1,
    # out_conv_channels=64 -> conv channels 8/16/32/64.
    batch, in_channels, dim = 2, 3, 16
    out_conv_channels = 64
    out_dim = dim // 16

    key = jax.random.PRNGKey(0)
    kx, kp, kl, kb = jax.random.split(key, 4)

    x = jax.random.normal(kx, (batch, in_channels, dim, dim), jnp.float32)
    params = init_params(kp, in_channels, out_conv_channels)

    feat = out_conv_channels * out_dim * out_dim
    lin_w = 0.02 * jax.random.normal(kl, (feat, 1), jnp.float32)   # Linear W^T
    lin_b = 0.02 * jax.random.normal(kb, (1,), jnp.float32)

    out = discriminator_forward(x, params, lin_w, lin_b)
    out = jax.block_until_ready(out)
    assert out.shape == (batch, 1)
    assert bool(jnp.all((out >= 0.0) & (out <= 1.0)))
    print("KERNEL_OK")
</pallas_src>

<mosaic_0001>
module attributes {stable_mosaic.version = 11 : i64} {
  func.func @conv_bn_lrelu_kernel(%arg0: i32, %arg1: memref<8x48xbf16, #tpu.memory_space<vmem>>, %arg2: memref<48x128xbf16, #tpu.memory_space<vmem>>, %arg3: memref<8x1xf32, #tpu.memory_space<vmem>>, %arg4: memref<8x1xf32, #tpu.memory_space<vmem>>, %arg5: memref<8x128xbf16, #tpu.memory_space<vmem>>, %arg6: memref<8x128xf32, #tpu.memory_space<vmem>>, %arg7: memref<8x1xf32, #tpu.memory_space<vmem>>, %arg8: memref<8x1xf32, #tpu.memory_space<vmem>>) attributes {dimension_semantics = [#tpu.dimension_semantics<arbitrary>], iteration_bounds = array<i64: 1>, scalar_prefetch = 0 : i64, scratch_operands = 3 : i64, tpu.core_type = #tpu.core_type<tc>, window_params = [{pipeline_mode = #tpu.pipeline_mode<synchronous>, transform_indices = @transform_0, window_bounds = array<i64: 8, 48>}, {transform_indices = @transform_1, window_bounds = array<i64: 48, 128>}, {pipeline_mode = #tpu.pipeline_mode<synchronous>, transform_indices = @transform_2, window_bounds = array<i64: 8, 1>}, {pipeline_mode = #tpu.pipeline_mode<synchronous>, transform_indices = @transform_3, window_bounds = array<i64: 8, 1>}, {pipeline_mode = #tpu.pipeline_mode<synchronous>, transform_indices = @transform_4, window_bounds = array<i64: 8, 128>}]} {
    %c0_i32 = arith.constant 0 : i32
    %0 = arith.cmpi eq, %arg0, %c0_i32 : i32
    %1 = arith.extui %0 : i1 to i32
    %c0_i32_0 = arith.constant 0 : i32
    %2 = arith.cmpi ne, %1, %c0_i32_0 : i32
    scf.if %2 {
      %cst_17 = arith.constant 0.000000e+00 : f32
      %24 = vector.broadcast %cst_17 : f32 to vector<8x1xf32>
      %c0_18 = arith.constant 0 : index
      %c0_19 = arith.constant 0 : index
      %25 = vector.load %arg7[%c0_18, %c0_19] : memref<8x1xf32, #tpu.memory_space<vmem>>, vector<8x1xf32>
      tpu.vector_store %arg7[%c0_18, %c0_19], %24 {strides = array<i32>} : memref<8x1xf32, #tpu.memory_space<vmem>>, vector<8x1xf32>,
      %cst_20 = arith.constant 0.000000e+00 : f32
      %26 = vector.broadcast %cst_20 : f32 to vector<8x1xf32>
      %c0_21 = arith.constant 0 : index
      %c0_22 = arith.constant 0 : index
      %27 = vector.load %arg8[%c0_21, %c0_22] : memref<8x1xf32, #tpu.memory_space<vmem>>, vector<8x1xf32>
      tpu.vector_store %arg8[%c0_21, %c0_22], %26 {strides = array<i32>} : memref<8x1xf32, #tpu.memory_space<vmem>>, vector<8x1xf32>,
    } else {
    }
    %c0 = arith.constant 0 : index
    %c0_1 = arith.constant 0 : index
    %3 = vector.load %arg1[%c0, %c0_1] : memref<8x48xbf16, #tpu.memory_space<vmem>>, vector<8x48xbf16>
    %c0_2 = arith.constant 0 : index
    %c0_3 = arith.constant 0 : index
    %4 = vector.load %arg2[%c0_2, %c0_3] : memref<48x128xbf16, #tpu.memory_space<vmem>>, vector<48x128xbf16>
    %cst = arith.constant dense<0.000000e+00> : vector<8x128xf32>
    %5 = tpu.matmul %3, %4, %cst {dimension_numbers = #tpu.dot_dimension_numbers<[1], [0], [0], [1], [0, 0, 1, 1], [], []>} : vector<8x48xbf16>, vector<48x128xbf16>, vector<8x128xf32> -> vector<8x128xf32>
    %c128_i32 = arith.constant 128 : i32
    %6 = arith.muli %arg0, %c128_i32 : i32
    %7 = tpu.assume_multiple %6, 128 : i32
    %c0_4 = arith.constant 0 : index
    %8 = arith.index_cast %7 : i32 to index
    %9 = vector.load %arg6[%c0_4, %8] : memref<8x128xf32, #tpu.memory_space<vmem>>, vector<8x128xf32>
    tpu.vector_store %arg6[%c0_4, %8], %5 {strides = array<i32>} : memref<8x128xf32, #tpu.memory_space<vmem>>, vector<8x128xf32>,
    %c0_5 = arith.constant 0 : index
    %c0_6 = arith.constant 0 : index
    %10 = vector.load %arg7[%c0_5, %c0_6] : memref<8x1xf32, #tpu.memory_space<vmem>>, vector<8x1xf32>
    %cst_7 = arith.constant dense<0.000000e+00> : vector<8xf32>
    %11 = vector.multi_reduction <add>, %5, %cst_7 [1] : vector<8x128xf32> to vector<8xf32>
    %12 = vector.shape_cast %11 : vector<8xf32> to vector<8x1xf32>
    %13 = arith.addf %10, %12 : vector<8x1xf32>
    %c0_8 = arith.constant 0 : index
    %c0_9 = arith.constant 0 : index
    %14 = vector.load %arg7[%c0_8, %c0_9] : memref<8x1xf32, #tpu.memory_space<vmem>>, vector<8x1xf32>
    tpu.vector_store %arg7[%c0_8, %c0_9], %13 {strides = array<i32>} : memref<8x1xf32, #tpu.memory_space<vmem>>, vector<8x1xf32>,
    %c0_10 = arith.constant 0 : index
    %c0_11 = arith.constant 0 : index
    %15 = vector.load %arg8[%c0_10, %c0_11] : memref<8x1xf32, #tpu.memory_space<vmem>>, vector<8x1xf32>
    %16 = arith.mulf %5, %5 : vector<8x128xf32>
    %cst_12 = arith.constant dense<0.000000e+00> : vector<8xf32>
    %17 = vector.multi_reduction <add>, %16, %cst_12 [1] : vector<8x128xf32> to vector<8xf32>
    %18 = vector.shape_cast %17 : vector<8xf32> to vector<8x1xf32>
    %19 = arith.addf %15, %18 : vector<8x1xf32>
    %c0_13 = arith.constant 0 : index
    %c0_14 = arith.constant 0 : index
    %20 = vector.load %arg8[%c0_13, %c0_14] : memref<8x1xf32, #tpu.memory_space<vmem>>, vector<8x1xf32>
    tpu.vector_store %arg8[%c0_13, %c0_14], %19 {strides = array<i32>} : memref<8x1xf32, #tpu.memory_space<vmem>>, vector<8x1xf32>,
    %c0_i32_15 = arith.constant 0 : i32
    %21 = arith.cmpi eq, %arg0, %c0_i32_15 : i32
    %22 = arith.extui %21 : i1 to i32
    %c0_i32_16 = arith.constant 0 : i32
    %23 = arith.cmpi ne, %22, %c0_i32_16 : i32
    scf.if %23 {
      %c0_17 = arith.constant 0 : index
      %c0_18 = arith.constant 0 : index
      %24 = vector.load %arg7[%c0_17, %c0_18] : memref<8x1xf32, #tpu.memory_space<vmem>>, vector<8x1xf32>
      %cst_19 = arith.constant 7.812500e-03 : f32
      %25 = vector.broadcast %cst_19 : f32 to vector<8x1xf32>
      %26 = arith.mulf %24, %25 : vector<8x1xf32>
      %c0_20 = arith.constant 0 : index
      %c0_21 = arith.constant 0 : index
      %27 = vector.load %arg8[%c0_20, %c0_21] : memref<8x1xf32, #tpu.memory_space<vmem>>, vector<8x1xf32>
      %cst_22 = arith.constant 7.812500e-03 : f32
      %28 = vector.broadcast %cst_22 : f32 to vector<8x1xf32>
      %29 = arith.mulf %27, %28 : vector<8x1xf32>
      %30 = arith.mulf %26, %26 : vector<8x1xf32>
      %31 = arith.subf %29, %30 : vector<8x1xf32>
      %cst_23 = arith.constant 0.000000e+00 : f32
      %32 = vector.broadcast %cst_23 : f32 to vector<8x1xf32>
      %33 = arith.maximumf %31, %32 : vector<8x1xf32>
      %c0_24 = arith.constant 0 : index
      %c0_25 = arith.constant 0 : index
      %34 = vector.load %arg3[%c0_24, %c0_25] : memref<8x1xf32, #tpu.memory_space<vmem>>, vector<8x1xf32>
      %cst_26 = arith.constant 9.99999974E-6 : f32
      %35 = vector.broadcast %cst_26 : f32 to vector<8x1xf32>
      %36 = arith.addf %33, %35 : vector<8x1xf32>
      %37 = math.rsqrt %36 : vector<8x1xf32>
      %38 = arith.mulf %34, %37 : vector<8x1xf32>
      %c0_27 = arith.constant 0 : index
      %c0_28 = arith.constant 0 : index
      %39 = vector.load %arg4[%c0_27, %c0_28] : memref<8x1xf32, #tpu.memory_space<vmem>>, vector<8x1xf32>
      %40 = arith.mulf %26, %38 : vector<8x1xf32>
      %41 = arith.subf %39, %40 : vector<8x1xf32>
      %c0_29 = arith.constant 0 : index
      %c0_30 = arith.constant 0 : index
      %42 = vector.load %arg6[%c0_29, %c0_30] : memref<8x128xf32, #tpu.memory_space<vmem>>, vector<8x128xf32>
      %43 = vector.broadcast %38 : vector<8x1xf32> to vector<8x128xf32>
      %44 = arith.mulf %42, %43 : vector<8x128xf32>
      %45 = vector.broadcast %41 : vector<8x1xf32> to vector<8x128xf32>
      %46 = arith.addf %44, %45 : vector<8x128xf32>
      %cst_31 = arith.constant 0.000000e+00 : f32
      %47 = vector.broadcast %cst_31 : f32 to vector<8x128xf32>
      %48 = arith.cmpf oge, %46, %47 : vector<8x128xf32>
      %cst_32 = arith.constant 2.000000e-01 : f32
      %49 = vector.broadcast %cst_32 : f32 to vector<8x128xf32>
      %50 = arith.mulf %49, %46 : vector<8x128xf32>
      %51 = arith.select %48, %46, %50 : vector<8x128xi1>, vector<8x128xf32>
      %52 = arith.truncf %51 : vector<8x128xf32> to vector<8x128xbf16>
      %c0_33 = arith.constant 0 : index
      %c0_34 = arith.constant 0 : index
      %53 = vector.load %arg5[%c0_33, %c0_34] : memref<8x128xbf16, #tpu.memory_space<vmem>>, vector<8x128xbf16>
      tpu.vector_store %arg5[%c0_33, %c0_34], %52 {strides = array<i32>} : memref<8x128xbf16, #tpu.memory_space<vmem>>, vector<8x128xbf16>,
    } else {
    }
    return
  }
  func.func @transform_0(%arg0: i32) -> (i32, i32) {
    %c0_i32 = arith.constant 0 : i32
    %c0_i32_0 = arith.constant 0 : i32
    %c0_i32_1 = arith.constant 0 : i32
    return %c0_i32, %c0_i32_0 : i32, i32
  }
  func.func @transform_1(%arg0: i32) -> (i32, i32) {
    %c0_i32 = arith.constant 0 : i32
    %c0_i32_0 = arith.constant 0 : i32
    return %c0_i32, %arg0 : i32, i32
  }
  func.func @transform_2(%arg0: i32) -> (i32, i32) {
    %c0_i32 = arith.constant 0 : i32
    %c0_i32_0 = arith.constant 0 : i32
    %c0_i32_1 = arith.constant 0 : i32
    return %c0_i32, %c0_i32_0 : i32, i32
  }
  func.func @transform_3(%arg0: i32) -> (i32, i32) {
    %c0_i32 = arith.constant 0 : i32
    %c0_i32_0 = arith.constant 0 : i32
    %c0_i32_1 = arith.constant 0 : i32
    return %c0_i32, %c0_i32_0 : i32, i32
  }
  func.func @transform_4(%arg0: i32) -> (i32, i32) {
    %c0_i32 = arith.constant 0 : i32
    %c0_i32_0 = arith.constant 0 : i32
    %c0_i32_1 = arith.constant 0 : i32
    return %c0_i32, %c0_i32_0 : i32, i32
  }
}

module attributes {stable_mosaic.version = 11 : i64} {
  func.func @conv_bn_lrelu_kernel(%arg0: i32, %arg1: memref<16x128xbf16, #tpu.memory_space<vmem>>, %arg2: memref<128x128xbf16, #tpu.memory_space<vmem>>, %arg3: memref<16x1xf32, #tpu.memory_space<vmem>>, %arg4: memref<16x1xf32, #tpu.memory_space<vmem>>, %arg5: memref<16x128xbf16, #tpu.memory_space<vmem>>, %arg6: memref<16x128xf32, #tpu.memory_space<vmem>>, %arg7: memref<16x1xf32, #tpu.memory_space<vmem>>, %arg8: memref<16x1xf32, #tpu.memory_space<vmem>>) attributes {dimension_semantics = [#tpu.dimension_semantics<arbitrary>], iteration_bounds = array<i64: 1>, scalar_prefetch = 0 : i64, scratch_operands = 3 : i64, tpu.core_type = #tpu.core_type<tc>, window_params = [{pipeline_mode = #tpu.pipeline_mode<synchronous>, transform_indices = @transform_0, window_bounds = array<i64: 16, 128>}, {transform_indices = @transform_1, window_bounds = array<i64: 128, 128>}, {pipeline_mode = #tpu.pipeline_mode<synchronous>, transform_indices = @transform_2, window_bounds = array<i64: 16, 1>}, {pipeline_mode = #tpu.pipeline_mode<synchronous>, transform_indices = @transform_3, window_bounds = array<i64: 16, 1>}, {pipeline_mode = #tpu.pipeline_mode<synchronous>, transform_indices = @transform_4, window_bounds = array<i64: 16, 128>}]} {
    %c0_i32 = arith.constant 0 : i32
    %0 = arith.cmpi eq, %arg0, %c0_i32 : i32
    %1 = arith.extui %0 : i1 to i32
    %c0_i32_0 = arith.constant 0 : i32
    %2 = arith.cmpi ne, %1, %c0_i32_0 : i32
    scf.if %2 {
      %cst_17 = arith.constant 0.000000e+00 : f32
      %24 = vector.broadcast %cst_17 : f32 to vector<16x1xf32>
      %c0_18 = arith.constant 0 : index
      %c0_19 = arith.constant 0 : index
      %25 = vector.load %arg7[%c0_18, %c0_19] : memref<16x1xf32, #tpu.memory_space<vmem>>, vector<16x1xf32>
      tpu.vector_store %arg7[%c0_18, %c0_19], %24 {strides = array<i32>} : memref<16x1xf32, #tpu.memory_space<vmem>>, vector<16x1xf32>,
      %cst_20 = arith.constant 0.000000e+00 : f32
      %26 = vector.broadcast %cst_20 : f32 to vector<16x1xf32>
      %c0_21 = arith.constant 0 : index
      %c0_22 = arith.constant 0 : index
      %27 = vector.load %arg8[%c0_21, %c0_22] : memref<16x1xf32, #tpu.memory_space<vmem>>, vector<16x1xf32>
      tpu.vector_store %arg8[%c0_21, %c0_22], %26 {strides = array<i32>} : memref<16x1xf32, #tpu.memory_space<vmem>>, vector<16x1xf32>,
    } else {
    }
    %c0 = arith.constant 0 : index
    %c0_1 = arith.constant 0 : index
    %3 = vector.load %arg1[%c0, %c0_1] : memref<16x128xbf16, #tpu.memory_space<vmem>>, vector<16x128xbf16>
    %c0_2 = arith.constant 0 : index
    %c0_3 = arith.constant 0 : index
    %4 = vector.load %arg2[%c0_2, %c0_3] : memref<128x128xbf16, #tpu.memory_space<vmem>>, vector<128x128xbf16>
    %cst = arith.constant dense<0.000000e+00> : vector<16x128xf32>
    %5 = tpu.matmul %3, %4, %cst {dimension_numbers = #tpu.dot_dimension_numbers<[1], [0], [0], [1], [0, 0, 1, 1], [], []>} : vector<16x128xbf16>, vector<128x128xbf16>, vector<16x128xf32> -> vector<16x128xf32>
    %c128_i32 = arith.constant 128 : i32
    %6 = arith.muli %arg0, %c128_i32 : i32
    %7 = tpu.assume_multiple %6, 128 : i32
    %c0_4 = arith.constant 0 : index
    %8 = arith.index_cast %7 : i32 to index
    %9 = vector.load %arg6[%c0_4, %8] : memref<16x128xf32, #tpu.memory_space<vmem>>, vector<16x128xf32>
    tpu.vector_store %arg6[%c0_4, %8], %5 {strides = array<i32>} : memref<16x128xf32, #tpu.memory_space<vmem>>, vector<16x128xf32>,
    %c0_5 = arith.constant 0 : index
    %c0_6 = arith.constant 0 : index
    %10 = vector.load %arg7[%c0_5, %c0_6] : memref<16x1xf32, #tpu.memory_space<vmem>>, vector<16x1xf32>
    %cst_7 = arith.constant dense<0.000000e+00> : vector<16xf32>
    %11 = vector.multi_reduction <add>, %5, %cst_7 [1] : vector<16x128xf32> to vector<16xf32>
    %12 = vector.shape_cast %11 : vector<16xf32> to vector<16x1xf32>
    %13 = arith.addf %10, %12 : vector<16x1xf32>
    %c0_8 = arith.constant 0 : index
    %c0_9 = arith.constant 0 : index
    %14 = vector.load %arg7[%c0_8, %c0_9] : memref<16x1xf32, #tpu.memory_space<vmem>>, vector<16x1xf32>
    tpu.vector_store %arg7[%c0_8, %c0_9], %13 {strides = array<i32>} : memref<16x1xf32, #tpu.memory_space<vmem>>, vector<16x1xf32>,
    %c0_10 = arith.constant 0 : index
    %c0_11 = arith.constant 0 : index
    %15 = vector.load %arg8[%c0_10, %c0_11] : memref<16x1xf32, #tpu.memory_space<vmem>>, vector<16x1xf32>
    %16 = arith.mulf %5, %5 : vector<16x128xf32>
    %cst_12 = arith.constant dense<0.000000e+00> : vector<16xf32>
    %17 = vector.multi_reduction <add>, %16, %cst_12 [1] : vector<16x128xf32> to vector<16xf32>
    %18 = vector.shape_cast %17 : vector<16xf32> to vector<16x1xf32>
    %19 = arith.addf %15, %18 : vector<16x1xf32>
    %c0_13 = arith.constant 0 : index
    %c0_14 = arith.constant 0 : index
    %20 = vector.load %arg8[%c0_13, %c0_14] : memref<16x1xf32, #tpu.memory_space<vmem>>, vector<16x1xf32>
    tpu.vector_store %arg8[%c0_13, %c0_14], %19 {strides = array<i32>} : memref<16x1xf32, #tpu.memory_space<vmem>>, vector<16x1xf32>,
    %c0_i32_15 = arith.constant 0 : i32
    %21 = arith.cmpi eq, %arg0, %c0_i32_15 : i32
    %22 = arith.extui %21 : i1 to i32
    %c0_i32_16 = arith.constant 0 : i32
    %23 = arith.cmpi ne, %22, %c0_i32_16 : i32
    scf.if %23 {
      %c0_17 = arith.constant 0 : index
      %c0_18 = arith.constant 0 : index
      %24 = vector.load %arg7[%c0_17, %c0_18] : memref<16x1xf32, #tpu.memory_space<vmem>>, vector<16x1xf32>
      %cst_19 = arith.constant 3.125000e-02 : f32
      %25 = vector.broadcast %cst_19 : f32 to vector<16x1xf32>
      %26 = arith.mulf %24, %25 : vector<16x1xf32>
      %c0_20 = arith.constant 0 : index
      %c0_21 = arith.constant 0 : index
      %27 = vector.load %arg8[%c0_20, %c0_21] : memref<16x1xf32, #tpu.memory_space<vmem>>, vector<16x1xf32>
      %cst_22 = arith.constant 3.125000e-02 : f32
      %28 = vector.broadcast %cst_22 : f32 to vector<16x1xf32>
      %29 = arith.mulf %27, %28 : vector<16x1xf32>
      %30 = arith.mulf %26, %26 : vector<16x1xf32>
      %31 = arith.subf %29, %30 : vector<16x1xf32>
      %cst_23 = arith.constant 0.000000e+00 : f32
      %32 = vector.broadcast %cst_23 : f32 to vector<16x1xf32>
      %33 = arith.maximumf %31, %32 : vector<16x1xf32>
      %c0_24 = arith.constant 0 : index
      %c0_25 = arith.constant 0 : index
      %34 = vector.load %arg3[%c0_24, %c0_25] : memref<16x1xf32, #tpu.memory_space<vmem>>, vector<16x1xf32>
      %cst_26 = arith.constant 9.99999974E-6 : f32
      %35 = vector.broadcast %cst_26 : f32 to vector<16x1xf32>
      %36 = arith.addf %33, %35 : vector<16x1xf32>
      %37 = math.rsqrt %36 : vector<16x1xf32>
      %38 = arith.mulf %34, %37 : vector<16x1xf32>
      %c0_27 = arith.constant 0 : index
      %c0_28 = arith.constant 0 : index
      %39 = vector.load %arg4[%c0_27, %c0_28] : memref<16x1xf32, #tpu.memory_space<vmem>>, vector<16x1xf32>
      %40 = arith.mulf %26, %38 : vector<16x1xf32>
      %41 = arith.subf %39, %40 : vector<16x1xf32>
      %c0_29 = arith.constant 0 : index
      %c0_30 = arith.constant 0 : index
      %42 = vector.load %arg6[%c0_29, %c0_30] : memref<16x128xf32, #tpu.memory_space<vmem>>, vector<16x128xf32>
      %43 = vector.broadcast %38 : vector<16x1xf32> to vector<16x128xf32>
      %44 = arith.mulf %42, %43 : vector<16x128xf32>
      %45 = vector.broadcast %41 : vector<16x1xf32> to vector<16x128xf32>
      %46 = arith.addf %44, %45 : vector<16x128xf32>
      %cst_31 = arith.constant 0.000000e+00 : f32
      %47 = vector.broadcast %cst_31 : f32 to vector<16x128xf32>
      %48 = arith.cmpf oge, %46, %47 : vector<16x128xf32>
      %cst_32 = arith.constant 2.000000e-01 : f32
      %49 = vector.broadcast %cst_32 : f32 to vector<16x128xf32>
      %50 = arith.mulf %49, %46 : vector<16x128xf32>
      %51 = arith.select %48, %46, %50 : vector<16x128xi1>, vector<16x128xf32>
      %52 = arith.truncf %51 : vector<16x128xf32> to vector<16x128xbf16>
      %c0_33 = arith.constant 0 : index
      %c0_34 = arith.constant 0 : index
      %53 = vector.load %arg5[%c0_33, %c0_34] : memref<16x128xbf16, #tpu.memory_space<vmem>>, vector<16x128xbf16>
      tpu.vector_store %arg5[%c0_33, %c0_34], %52 {strides = array<i32>} : memref<16x128xbf16, #tpu.memory_space<vmem>>, vector<16x128xbf16>,
    } else {
    }
    return
  }
  func.func @transform_0(%arg0: i32) -> (i32, i32) {
    %c0_i32 = arith.constant 0 : i32
    %c0_i32_0 = arith.constant 0 : i32
    %c0_i32_1 = arith.constant 0 : i32
    return %c0_i32, %c0_i32_0 : i32, i32
  }
  func.func @transform_1(%arg0: i32) -> (i32, i32) {
    %c0_i32 = arith.constant 0 : i32
    %c0_i32_0 = arith.constant 0 : i32
    return %c0_i32, %arg0 : i32, i32
  }
  func.func @transform_2(%arg0: i32) -> (i32, i32) {
    %c0_i32 = arith.constant 0 : i32
    %c0_i32_0 = arith.constant 0 : i32
    %c0_i32_1 = arith.constant 0 : i32
    return %c0_i32, %c0_i32_0 : i32, i32
  }
  func.func @transform_3(%arg0: i32) -> (i32, i32) {
    %c0_i32 = arith.constant 0 : i32
    %c0_i32_0 = arith.constant 0 : i32
    %c0_i32_1 = arith.constant 0 : i32
    return %c0_i32, %c0_i32_0 : i32, i32
  }
  func.func @transform_4(%arg0: i32) -> (i32, i32) {
    %c0_i32 = arith.constant 0 : i32
    %c0_i32_0 = arith.constant 0 : i32
    %c0_i32_1 = arith.constant 0 : i32
    return %c0_i32, %c0_i32_0 : i32, i32
  }
}

module attributes {stable_mosaic.version = 11 : i64} {
  func.func @conv_bn_lrelu_kernel(%arg0: i32, %arg1: memref<32x256xbf16, #tpu.memory_space<vmem>>, %arg2: memref<256x128xbf16, #tpu.memory_space<vmem>>, %arg3: memref<32x1xf32, #tpu.memory_space<vmem>>, %arg4: memref<32x1xf32, #tpu.memory_space<vmem>>, %arg5: memref<32x128xbf16, #tpu.memory_space<vmem>>, %arg6: memref<32x128xf32, #tpu.memory_space<vmem>>, %arg7: memref<32x1xf32, #tpu.memory_space<vmem>>, %arg8: memref<32x1xf32, #tpu.memory_space<vmem>>) attributes {dimension_semantics = [#tpu.dimension_semantics<arbitrary>], iteration_bounds = array<i64: 1>, scalar_prefetch = 0 : i64, scratch_operands = 3 : i64, tpu.core_type = #tpu.core_type<tc>, window_params = [{pipeline_mode = #tpu.pipeline_mode<synchronous>, transform_indices = @transform_0, window_bounds = array<i64: 32, 256>}, {transform_indices = @transform_1, window_bounds = array<i64: 256, 128>}, {pipeline_mode = #tpu.pipeline_mode<synchronous>, transform_indices = @transform_2, window_bounds = array<i64: 32, 1>}, {pipeline_mode = #tpu.pipeline_mode<synchronous>, transform_indices = @transform_3, window_bounds = array<i64: 32, 1>}, {pipeline_mode = #tpu.pipeline_mode<synchronous>, transform_indices = @transform_4, window_bounds = array<i64: 32, 128>}]} {
    %c0_i32 = arith.constant 0 : i32
    %0 = arith.cmpi eq, %arg0, %c0_i32 : i32
    %1 = arith.extui %0 : i1 to i32
    %c0_i32_0 = arith.constant 0 : i32
    %2 = arith.cmpi ne, %1, %c0_i32_0 : i32
    scf.if %2 {
      %cst_17 = arith.constant 0.000000e+00 : f32
      %24 = vector.broadcast %cst_17 : f32 to vector<32x1xf32>
      %c0_18 = arith.constant 0 : index
      %c0_19 = arith.constant 0 : index
      %25 = vector.load %arg7[%c0_18, %c0_19] : memref<32x1xf32, #tpu.memory_space<vmem>>, vector<32x1xf32>
      tpu.vector_store %arg7[%c0_18, %c0_19], %24 {strides = array<i32>} : memref<32x1xf32, #tpu.memory_space<vmem>>, vector<32x1xf32>,
      %cst_20 = arith.constant 0.000000e+00 : f32
      %26 = vector.broadcast %cst_20 : f32 to vector<32x1xf32>
      %c0_21 = arith.constant 0 : index
      %c0_22 = arith.constant 0 : index
      %27 = vector.load %arg8[%c0_21, %c0_22] : memref<32x1xf32, #tpu.memory_space<vmem>>, vector<32x1xf32>
      tpu.vector_store %arg8[%c0_21, %c0_22], %26 {strides = array<i32>} : memref<32x1xf32, #tpu.memory_space<vmem>>, vector<32x1xf32>,
    } else {
    }
    %c0 = arith.constant 0 : index
    %c0_1 = arith.constant 0 : index
    %3 = vector.load %arg1[%c0, %c0_1] : memref<32x256xbf16, #tpu.memory_space<vmem>>, vector<32x256xbf16>
    %c0_2 = arith.constant 0 : index
    %c0_3 = arith.constant 0 : index
    %4 = vector.load %arg2[%c0_2, %c0_3] : memref<256x128xbf16, #tpu.memory_space<vmem>>, vector<256x128xbf16>
    %cst = arith.constant dense<0.000000e+00> : vector<32x128xf32>
    %5 = tpu.matmul %3, %4, %cst {dimension_numbers = #tpu.dot_dimension_numbers<[1], [0], [0], [1], [0, 0, 1, 1], [], []>} : vector<32x256xbf16>, vector<256x128xbf16>, vector<32x128xf32> -> vector<32x128xf32>
    %c128_i32 = arith.constant 128 : i32
    %6 = arith.muli %arg0, %c128_i32 : i32
    %7 = tpu.assume_multiple %6, 128 : i32
    %c0_4 = arith.constant 0 : index
    %8 = arith.index_cast %7 : i32 to index
    %9 = vector.load %arg6[%c0_4, %8] : memref<32x128xf32, #tpu.memory_space<vmem>>, vector<32x128xf32>
    tpu.vector_store %arg6[%c0_4, %8], %5 {strides = array<i32>} : memref<32x128xf32, #tpu.memory_space<vmem>>, vector<32x128xf32>,
    %c0_5 = arith.constant 0 : index
    %c0_6 = arith.constant 0 : index
    %10 = vector.load %arg7[%c0_5, %c0_6] : memref<32x1xf32, #tpu.memory_space<vmem>>, vector<32x1xf32>
    %cst_7 = arith.constant dense<0.000000e+00> : vector<32xf32>
    %11 = vector.multi_reduction <add>, %5, %cst_7 [1] : vector<32x128xf32> to vector<32xf32>
    %12 = vector.shape_cast %11 : vector<32xf32> to vector<32x1xf32>
    %13 = arith.addf %10, %12 : vector<32x1xf32>
    %c0_8 = arith.constant 0 : index
    %c0_9 = arith.constant 0 : index
    %14 = vector.load %arg7[%c0_8, %c0_9] : memref<32x1xf32, #tpu.memory_space<vmem>>, vector<32x1xf32>
    tpu.vector_store %arg7[%c0_8, %c0_9], %13 {strides = array<i32>} : memref<32x1xf32, #tpu.memory_space<vmem>>, vector<32x1xf32>,
    %c0_10 = arith.constant 0 : index
    %c0_11 = arith.constant 0 : index
    %15 = vector.load %arg8[%c0_10, %c0_11] : memref<32x1xf32, #tpu.memory_space<vmem>>, vector<32x1xf32>
    %16 = arith.mulf %5, %5 : vector<32x128xf32>
    %cst_12 = arith.constant dense<0.000000e+00> : vector<32xf32>
    %17 = vector.multi_reduction <add>, %16, %cst_12 [1] : vector<32x128xf32> to vector<32xf32>
    %18 = vector.shape_cast %17 : vector<32xf32> to vector<32x1xf32>
    %19 = arith.addf %15, %18 : vector<32x1xf32>
    %c0_13 = arith.constant 0 : index
    %c0_14 = arith.constant 0 : index
    %20 = vector.load %arg8[%c0_13, %c0_14] : memref<32x1xf32, #tpu.memory_space<vmem>>, vector<32x1xf32>
    tpu.vector_store %arg8[%c0_13, %c0_14], %19 {strides = array<i32>} : memref<32x1xf32, #tpu.memory_space<vmem>>, vector<32x1xf32>,
    %c0_i32_15 = arith.constant 0 : i32
    %21 = arith.cmpi eq, %arg0, %c0_i32_15 : i32
    %22 = arith.extui %21 : i1 to i32
    %c0_i32_16 = arith.constant 0 : i32
    %23 = arith.cmpi ne, %22, %c0_i32_16 : i32
    scf.if %23 {
      %c0_17 = arith.constant 0 : index
      %c0_18 = arith.constant 0 : index
      %24 = vector.load %arg7[%c0_17, %c0_18] : memref<32x1xf32, #tpu.memory_space<vmem>>, vector<32x1xf32>
      %cst_19 = arith.constant 1.250000e-01 : f32
      %25 = vector.broadcast %cst_19 : f32 to vector<32x1xf32>
      %26 = arith.mulf %24, %25 : vector<32x1xf32>
      %c0_20 = arith.constant 0 : index
      %c0_21 = arith.constant 0 : index
      %27 = vector.load %arg8[%c0_20, %c0_21] : memref<32x1xf32, #tpu.memory_space<vmem>>, vector<32x1xf32>
      %cst_22 = arith.constant 1.250000e-01 : f32
      %28 = vector.broadcast %cst_22 : f32 to vector<32x1xf32>
      %29 = arith.mulf %27, %28 : vector<32x1xf32>
      %30 = arith.mulf %26, %26 : vector<32x1xf32>
      %31 = arith.subf %29, %30 : vector<32x1xf32>
      %cst_23 = arith.constant 0.000000e+00 : f32
      %32 = vector.broadcast %cst_23 : f32 to vector<32x1xf32>
      %33 = arith.maximumf %31, %32 : vector<32x1xf32>
      %c0_24 = arith.constant 0 : index
      %c0_25 = arith.constant 0 : index
      %34 = vector.load %arg3[%c0_24, %c0_25] : memref<32x1xf32, #tpu.memory_space<vmem>>, vector<32x1xf32>
      %cst_26 = arith.constant 9.99999974E-6 : f32
      %35 = vector.broadcast %cst_26 : f32 to vector<32x1xf32>
      %36 = arith.addf %33, %35 : vector<32x1xf32>
      %37 = math.rsqrt %36 : vector<32x1xf32>
      %38 = arith.mulf %34, %37 : vector<32x1xf32>
      %c0_27 = arith.constant 0 : index
      %c0_28 = arith.constant 0 : index
      %39 = vector.load %arg4[%c0_27, %c0_28] : memref<32x1xf32, #tpu.memory_space<vmem>>, vector<32x1xf32>
      %40 = arith.mulf %26, %38 : vector<32x1xf32>
      %41 = arith.subf %39, %40 : vector<32x1xf32>
      %c0_29 = arith.constant 0 : index
      %c0_30 = arith.constant 0 : index
      %42 = vector.load %arg6[%c0_29, %c0_30] : memref<32x128xf32, #tpu.memory_space<vmem>>, vector<32x128xf32>
      %43 = vector.broadcast %38 : vector<32x1xf32> to vector<32x128xf32>
      %44 = arith.mulf %42, %43 : vector<32x128xf32>
      %45 = vector.broadcast %41 : vector<32x1xf32> to vector<32x128xf32>
      %46 = arith.addf %44, %45 : vector<32x128xf32>
      %cst_31 = arith.constant 0.000000e+00 : f32
      %47 = vector.broadcast %cst_31 : f32 to vector<32x128xf32>
      %48 = arith.cmpf oge, %46, %47 : vector<32x128xf32>
      %cst_32 = arith.constant 2.000000e-01 : f32
      %49 = vector.broadcast %cst_32 : f32 to vector<32x128xf32>
      %50 = arith.mulf %49, %46 : vector<32x128xf32>
      %51 = arith.select %48, %46, %50 : vector<32x128xi1>, vector<32x128xf32>
      %52 = arith.truncf %51 : vector<32x128xf32> to vector<32x128xbf16>
      %c0_33 = arith.constant 0 : index
      %c0_34 = arith.constant 0 : index
      %53 = vector.load %arg5[%c0_33, %c0_34] : memref<32x128xbf16, #tpu.memory_space<vmem>>, vector<32x128xbf16>
      tpu.vector_store %arg5[%c0_33, %c0_34], %52 {strides = array<i32>} : memref<32x128xbf16, #tpu.memory_space<vmem>>, vector<32x128xbf16>,
    } else {
    }
    return
  }
  func.func @transform_0(%arg0: i32) -> (i32, i32) {
    %c0_i32 = arith.constant 0 : i32
    %c0_i32_0 = arith.constant 0 : i32
    %c0_i32_1 = arith.constant 0 : i32
    return %c0_i32, %c0_i32_0 : i32, i32
  }
  func.func @transform_1(%arg0: i32) -> (i32, i32) {
    %c0_i32 = arith.constant 0 : i32
    %c0_i32_0 = arith.constant 0 : i32
    return %c0_i32, %arg0 : i32, i32
  }
  func.func @transform_2(%arg0: i32) -> (i32, i32) {
    %c0_i32 = arith.constant 0 : i32
    %c0_i32_0 = arith.constant 0 : i32
    %c0_i32_1 = arith.constant 0 : i32
    return %c0_i32, %c0_i32_0 : i32, i32
  }
  func.func @transform_3(%arg0: i32) -> (i32, i32) {
    %c0_i32 = arith.constant 0 : i32
    %c0_i32_0 = arith.constant 0 : i32
    %c0_i32_1 = arith.constant 0 : i32
    return %c0_i32, %c0_i32_0 : i32, i32
  }
  func.func @transform_4(%arg0: i32) -> (i32, i32) {
    %c0_i32 = arith.constant 0 : i32
    %c0_i32_0 = arith.constant 0 : i32
    %c0_i32_1 = arith.constant 0 : i32
    return %c0_i32, %c0_i32_0 : i32, i32
  }
}

module attributes {stable_mosaic.version = 11 : i64} {
  func.func @conv_bn_lrelu_kernel(%arg0: i32, %arg1: memref<64x512xbf16, #tpu.memory_space<vmem>>, %arg2: memref<512x128xbf16, #tpu.memory_space<vmem>>, %arg3: memref<64x1xf32, #tpu.memory_space<vmem>>, %arg4: memref<64x1xf32, #tpu.memory_space<vmem>>, %arg5: memref<64x128xbf16, #tpu.memory_space<vmem>>, %arg6: memref<64x128xf32, #tpu.memory_space<vmem>>, %arg7: memref<64x1xf32, #tpu.memory_space<vmem>>, %arg8: memref<64x1xf32, #tpu.memory_space<vmem>>) attributes {dimension_semantics = [#tpu.dimension_semantics<arbitrary>], iteration_bounds = array<i64: 1>, scalar_prefetch = 0 : i64, scratch_operands = 3 : i64, tpu.core_type = #tpu.core_type<tc>, window_params = [{pipeline_mode = #tpu.pipeline_mode<synchronous>, transform_indices = @transform_0, window_bounds = array<i64: 64, 512>}, {transform_indices = @transform_1, window_bounds = array<i64: 512, 128>}, {pipeline_mode = #tpu.pipeline_mode<synchronous>, transform_indices = @transform_2, window_bounds = array<i64: 64, 1>}, {pipeline_mode = #tpu.pipeline_mode<synchronous>, transform_indices = @transform_3, window_bounds = array<i64: 64, 1>}, {pipeline_mode = #tpu.pipeline_mode<synchronous>, transform_indices = @transform_4, window_bounds = array<i64: 64, 128>}]} {
    %c0_i32 = arith.constant 0 : i32
    %0 = arith.cmpi eq, %arg0, %c0_i32 : i32
    %1 = arith.extui %0 : i1 to i32
    %c0_i32_0 = arith.constant 0 : i32
    %2 = arith.cmpi ne, %1, %c0_i32_0 : i32
    scf.if %2 {
      %cst_17 = arith.constant 0.000000e+00 : f32
      %24 = vector.broadcast %cst_17 : f32 to vector<64x1xf32>
      %c0_18 = arith.constant 0 : index
      %c0_19 = arith.constant 0 : index
      %25 = vector.load %arg7[%c0_18, %c0_19] : memref<64x1xf32, #tpu.memory_space<vmem>>, vector<64x1xf32>
      tpu.vector_store %arg7[%c0_18, %c0_19], %24 {strides = array<i32>} : memref<64x1xf32, #tpu.memory_space<vmem>>, vector<64x1xf32>,
      %cst_20 = arith.constant 0.000000e+00 : f32
      %26 = vector.broadcast %cst_20 : f32 to vector<64x1xf32>
      %c0_21 = arith.constant 0 : index
      %c0_22 = arith.constant 0 : index
      %27 = vector.load %arg8[%c0_21, %c0_22] : memref<64x1xf32, #tpu.memory_space<vmem>>, vector<64x1xf32>
      tpu.vector_store %arg8[%c0_21, %c0_22], %26 {strides = array<i32>} : memref<64x1xf32, #tpu.memory_space<vmem>>, vector<64x1xf32>,
    } else {
    }
    %c0 = arith.constant 0 : index
    %c0_1 = arith.constant 0 : index
    %3 = vector.load %arg1[%c0, %c0_1] : memref<64x512xbf16, #tpu.memory_space<vmem>>, vector<64x512xbf16>
    %c0_2 = arith.constant 0 : index
    %c0_3 = arith.constant 0 : index
    %4 = vector.load %arg2[%c0_2, %c0_3] : memref<512x128xbf16, #tpu.memory_space<vmem>>, vector<512x128xbf16>
    %cst = arith.constant dense<0.000000e+00> : vector<64x128xf32>
    %5 = tpu.matmul %3, %4, %cst {dimension_numbers = #tpu.dot_dimension_numbers<[1], [0], [0], [1], [0, 0, 1, 1], [], []>} : vector<64x512xbf16>, vector<512x128xbf16>, vector<64x128xf32> -> vector<64x128xf32>
    %c128_i32 = arith.constant 128 : i32
    %6 = arith.muli %arg0, %c128_i32 : i32
    %7 = tpu.assume_multiple %6, 128 : i32
    %c0_4 = arith.constant 0 : index
    %8 = arith.index_cast %7 : i32 to index
    %9 = vector.load %arg6[%c0_4, %8] : memref<64x128xf32, #tpu.memory_space<vmem>>, vector<64x128xf32>
    tpu.vector_store %arg6[%c0_4, %8], %5 {strides = array<i32>} : memref<64x128xf32, #tpu.memory_space<vmem>>, vector<64x128xf32>,
    %c0_5 = arith.constant 0 : index
    %c0_6 = arith.constant 0 : index
    %10 = vector.load %arg7[%c0_5, %c0_6] : memref<64x1xf32, #tpu.memory_space<vmem>>, vector<64x1xf32>
    %cst_7 = arith.constant dense<0.000000e+00> : vector<64xf32>
    %11 = vector.multi_reduction <add>, %5, %cst_7 [1] : vector<64x128xf32> to vector<64xf32>
    %12 = vector.shape_cast %11 : vector<64xf32> to vector<64x1xf32>
    %13 = arith.addf %10, %12 : vector<64x1xf32>
    %c0_8 = arith.constant 0 : index
    %c0_9 = arith.constant 0 : index
    %14 = vector.load %arg7[%c0_8, %c0_9] : memref<64x1xf32, #tpu.memory_space<vmem>>, vector<64x1xf32>
    tpu.vector_store %arg7[%c0_8, %c0_9], %13 {strides = array<i32>} : memref<64x1xf32, #tpu.memory_space<vmem>>, vector<64x1xf32>,
    %c0_10 = arith.constant 0 : index
    %c0_11 = arith.constant 0 : index
    %15 = vector.load %arg8[%c0_10, %c0_11] : memref<64x1xf32, #tpu.memory_space<vmem>>, vector<64x1xf32>
    %16 = arith.mulf %5, %5 : vector<64x128xf32>
    %cst_12 = arith.constant dense<0.000000e+00> : vector<64xf32>
    %17 = vector.multi_reduction <add>, %16, %cst_12 [1] : vector<64x128xf32> to vector<64xf32>
    %18 = vector.shape_cast %17 : vector<64xf32> to vector<64x1xf32>
    %19 = arith.addf %15, %18 : vector<64x1xf32>
    %c0_13 = arith.constant 0 : index
    %c0_14 = arith.constant 0 : index
    %20 = vector.load %arg8[%c0_13, %c0_14] : memref<64x1xf32, #tpu.memory_space<vmem>>, vector<64x1xf32>
    tpu.vector_store %arg8[%c0_13, %c0_14], %19 {strides = array<i32>} : memref<64x1xf32, #tpu.memory_space<vmem>>, vector<64x1xf32>,
    %c0_i32_15 = arith.constant 0 : i32
    %21 = arith.cmpi eq, %arg0, %c0_i32_15 : i32
    %22 = arith.extui %21 : i1 to i32
    %c0_i32_16 = arith.constant 0 : i32
    %23 = arith.cmpi ne, %22, %c0_i32_16 : i32
    scf.if %23 {
      %c0_17 = arith.constant 0 : index
      %c0_18 = arith.constant 0 : index
      %24 = vector.load %arg7[%c0_17, %c0_18] : memref<64x1xf32, #tpu.memory_space<vmem>>, vector<64x1xf32>
      %cst_19 = arith.constant 5.000000e-01 : f32
      %25 = vector.broadcast %cst_19 : f32 to vector<64x1xf32>
      %26 = arith.mulf %24, %25 : vector<64x1xf32>
      %c0_20 = arith.constant 0 : index
      %c0_21 = arith.constant 0 : index
      %27 = vector.load %arg8[%c0_20, %c0_21] : memref<64x1xf32, #tpu.memory_space<vmem>>, vector<64x1xf32>
      %cst_22 = arith.constant 5.000000e-01 : f32
      %28 = vector.broadcast %cst_22 : f32 to vector<64x1xf32>
      %29 = arith.mulf %27, %28 : vector<64x1xf32>
      %30 = arith.mulf %26, %26 : vector<64x1xf32>
      %31 = arith.subf %29, %30 : vector<64x1xf32>
      %cst_23 = arith.constant 0.000000e+00 : f32
      %32 = vector.broadcast %cst_23 : f32 to vector<64x1xf32>
      %33 = arith.maximumf %31, %32 : vector<64x1xf32>
      %c0_24 = arith.constant 0 : index
      %c0_25 = arith.constant 0 : index
      %34 = vector.load %arg3[%c0_24, %c0_25] : memref<64x1xf32, #tpu.memory_space<vmem>>, vector<64x1xf32>
      %cst_26 = arith.constant 9.99999974E-6 : f32
      %35 = vector.broadcast %cst_26 : f32 to vector<64x1xf32>
      %36 = arith.addf %33, %35 : vector<64x1xf32>
      %37 = math.rsqrt %36 : vector<64x1xf32>
      %38 = arith.mulf %34, %37 : vector<64x1xf32>
      %c0_27 = arith.constant 0 : index
      %c0_28 = arith.constant 0 : index
      %39 = vector.load %arg4[%c0_27, %c0_28] : memref<64x1xf32, #tpu.memory_space<vmem>>, vector<64x1xf32>
      %40 = arith.mulf %26, %38 : vector<64x1xf32>
      %41 = arith.subf %39, %40 : vector<64x1xf32>
      %c0_29 = arith.constant 0 : index
      %c0_30 = arith.constant 0 : index
      %42 = vector.load %arg6[%c0_29, %c0_30] : memref<64x128xf32, #tpu.memory_space<vmem>>, vector<64x128xf32>
      %43 = vector.broadcast %38 : vector<64x1xf32> to vector<64x128xf32>
      %44 = arith.mulf %42, %43 : vector<64x128xf32>
      %45 = vector.broadcast %41 : vector<64x1xf32> to vector<64x128xf32>
      %46 = arith.addf %44, %45 : vector<64x128xf32>
      %cst_31 = arith.constant 0.000000e+00 : f32
      %47 = vector.broadcast %cst_31 : f32 to vector<64x128xf32>
      %48 = arith.cmpf oge, %46, %47 : vector<64x128xf32>
      %cst_32 = arith.constant 2.000000e-01 : f32
      %49 = vector.broadcast %cst_32 : f32 to vector<64x128xf32>
      %50 = arith.mulf %49, %46 : vector<64x128xf32>
      %51 = arith.select %48, %46, %50 : vector<64x128xi1>, vector<64x128xf32>
      %52 = arith.truncf %51 : vector<64x128xf32> to vector<64x128xbf16>
      %c0_33 = arith.constant 0 : index
      %c0_34 = arith.constant 0 : index
      %53 = vector.load %arg5[%c0_33, %c0_34] : memref<64x128xbf16, #tpu.memory_space<vmem>>, vector<64x128xbf16>
      tpu.vector_store %arg5[%c0_33, %c0_34], %52 {strides = array<i32>} : memref<64x128xbf16, #tpu.memory_space<vmem>>, vector<64x128xbf16>,
    } else {
    }
    return
  }
  func.func @transform_0(%arg0: i32) -> (i32, i32) {
    %c0_i32 = arith.constant 0 : i32
    %c0_i32_0 = arith.constant 0 : i32
    %c0_i32_1 = arith.constant 0 : i32
    return %c0_i32, %c0_i32_0 : i32, i32
  }
  func.func @transform_1(%arg0: i32) -> (i32, i32) {
    %c0_i32 = arith.constant 0 : i32
    %c0_i32_0 = arith.constant 0 : i32
    return %c0_i32, %arg0 : i32, i32
  }
  func.func @transform_2(%arg0: i32) -> (i32, i32) {
    %c0_i32 = arith.constant 0 : i32
    %c0_i32_0 = arith.constant 0 : i32
    %c0_i32_1 = arith.constant 0 : i32
    return %c0_i32, %c0_i32_0 : i32, i32
  }
  func.func @transform_3(%arg0: i32) -> (i32, i32) {
    %c0_i32 = arith.constant 0 : i32
    %c0_i32_0 = arith.constant 0 : i32
    %c0_i32_1 = arith.constant 0 : i32
    return %c0_i32, %c0_i32_0 : i32, i32
  }
  func.func @transform_4(%arg0: i32) -> (i32, i32) {
    %c0_i32 = arith.constant 0 : i32
    %c0_i32_0 = arith.constant 0 : i32
    %c0_i32_1 = arith.constant 0 : i32
    return %c0_i32, %c0_i32_0 : i32, i32
  }
}

</mosaic_0001>

<bundles_post_ra>
// kernel: discriminator_forward.4
= control target key start
LH: loop header
LB: loop body
LE: loop exit
PB: predicated region body
PF: predicated region fallthrough
CT: control target
= control target key end

     0   :  { %v179_v0 = vmov 0.0   ;;  %vm180_vm0 = vmmov 0   ;;  %vm50_vm1 = vcmask 392192   ;;  %vm22_vm2 = vcmask 7168   ;;  %s232_s1 = inlined_call_operand.vmem [shape: bf16[48,128], index: 1, kind: input, shape index: {}]   ;;  %s233_s0 = inlined_call_operand.vmem [shape: bf16[8,48], index: 0, kind: input, shape index: {}]   ;;  %s234_s2 = inlined_call_operand.vmem [shape: f32[8,1], index: 2, kind: input, shape index: {}]   ;;  %s235_s3 = inlined_call_operand.vmem [shape: f32[8,1], index: 3, kind: input, shape index: {}]   ;;  %s236_s4 = inlined_call_operand.vmem [shape: bf16[8,128], index: 4, kind: output, shape index: {}]  }
   0x1   :  { %159 = vmatprep.subr.bf16.mxu0 %v179_v0  ;;  %v174_v1 = vld [vmem:[%s232_s1 + $0x10] sm:$0xff]   ;;  %165 = vmatprep.mubr.msk.bf16.mxu0 %vm180_vm0, %v179_v0  ;;  %v175_v2 = vld [vmem:[%s232_s1 + $0x8] sm:$0xff]   ;;  %v176_v3 = vld [vmem:[%s232_s1] sm:$0xff]   ;;  %23 = vst.msk [vmem:[#allocation3] sm:$0xff] %vm22_vm2, %v179_v0  ;;  %v181_v10 = vmov 0  }
   0x2   :  { %160 = vmatpush3.bf16.msra.mxu0 %v174_v1  ;;  %v25_v4 = vld [vmem:[%s233_s0] sm:$0xf]  ;;  %24 = vst.msk [vmem:[#allocation4] sm:$0xff] %vm22_vm2, %v179_v0  ;;  %172 = vset.pattern.permute.xlu1 %v181_v10 }
   0x3   :  { %161 = vmatprep.subr.bf16.mxu0 %v179_v0  ;;  %173 = vset.pattern.permute.xlu0 %v181_v10  ;;  %v121_v25 = vld [vmem:[%s234_s2] sm:$0xff] }
   0x4   :  { %v125_v28 = vld [vmem:[%s235_s3] sm:$0xff] }
   0x6   :  { %162 = vmatpush3.bf16.msra.mxu0 %v175_v2 }
   0x7   :  { %163 = vmatprep.subr.bf16.mxu0 %v179_v0 }
   0x8   :  { %v99_v11 = vld [vmem:[#allocation3] sm:$0xff] }
   0x9   :  { %v105_v14 = vld [vmem:[#allocation4] sm:$0xff] }
   0xa   :  { %164 = vmatpush3.bf16.msra.mxu0 %v176_v3 }
   0xd   :  { %166 = vmatmul.mubr.msk.bf16.vlgmr.msra.gmra.mxu0 %vm50_vm1, %v25_v4 }
  0xcd   :  { %v88_v5 = vpop.f32.mrf.mxu0 }
  0xce   :  { %100 = vadd.xlane.f32.xlu0 %v88_v5  ;;  %v106_v7 = vmul.f32 %v88_v5, %v88_v5 }
  0xcf   :  { %v167_v6 = vpop.f32.mrf.mxu0 }
  0xd1   :  { %v91_v8 = vpop.f32.mrf.mxu0 }
  0xd2   :  { %107 = vadd.xlane.f32.xlu0 %v106_v7 }
  0xd3   :  { %v168_v9 = vpop.f32.mrf.mxu0 }
 0x157   :  { %v101_v12 = vpop.xlane.xlu0 %100 }
 0x158   :  { %v102_v13 = vadd.f32 %v101_v12, %v99_v11 }
 0x15a   :  { %104 = vst.msk [vmem:[#allocation3] sm:$0xff] %vm22_vm2, %v102_v13 }
 0x15b   :  { %v108_v15 = vpop.xlane.xlu0 %107 }
 0x15c   :  { %v109_v16 = vadd.f32 %v108_v15, %v105_v14 }
 0x15e   :  { %110 = vst.msk [vmem:[#allocation4] sm:$0xff] %vm22_vm2, %v109_v16 }
 0x161   :  { %v114_v17 = vld [vmem:[#allocation3] sm:$0xff] }
 0x162   :  { %v115_v18 = vmul.f32 0.0078125, %v114_v17 }
 0x164   :  { %v118_v21 = vmul.f32 %v115_v18, %v115_v18 }
 0x165   :  { %v116_v19 = vld [vmem:[#allocation4] sm:$0xff] }
 0x166   :  { %v117_v20 = vmul.f32 0.0078125, %v116_v19 }
 0x168   :  { %v119_v22 = vsub.f32 %v117_v20, %v118_v21 }
 0x16a   :  { %v120_v23 = vmax.f32 %v119_v22, 0.0 }
 0x16c   :  { %v122_v24 = vadd.f32 1e-05, %v120_v23 }
 0x16e   :  { %177 = vrsqrt.f32 %v122_v24 }
 0x17b   :  { %v178_v26 = vpop.eup %177 }
 0x17c   :  { %v124_v27 = vmul.f32 %v178_v26, %v121_v25 }
 0x17e   :  { %131 = vperm.xlu1 %172, %v124_v27   ;;  %v126_v29 = vmul.f32 %v124_v27, %v115_v18 }
 0x180   :  { %v127_v30 = vsub.f32 %v125_v28, %v126_v29 }
 0x182   :  { %137 = vperm.xlu1 %172, %v127_v30  }
 0x1f9   :  { %v132_v31 = vpop.permute.xlu1 %131 }
 0x1fa   :  { %v134_v32 = vmul.f32 %v132_v31, %v88_v5 }
 0x1fd   :  { %v138_v33 = vpop.permute.xlu1 %137 }
 0x1fe   :  { %v140_v34 = vadd.f32 %v138_v33, %v134_v32 }
 0x200   :  { %vm141_vm3 = vcmp.ge.f32.partialorder %v140_v34, 0.0  ;;  %v142_v35 = vmul.f32 0.2, %v140_v34 }
 0x202   :  { %v143_v36 = vsel %vm141_vm3, %v140_v34, %v142_v35 }
 0x203   :  { %v144_v37 = vpack.c.bf16 %v143_v36, %v143_v36 }
 0x205   :  { %145 = vst [vmem:[%s236_s4] sm:$0xf] %v144_v37 }

// kernel: discriminator_forward.5
= control target key start
LH: loop header
LB: loop body
LE: loop exit
PB: predicated region body
PF: predicated region fallthrough
CT: control target
= control target key end

     0   :  { %v312_v0 = vmov 0.0   ;;  %vm313_vm0 = vmmov 0   ;;  %vm22_vm1 = vcmask 7168   ;;  %v314_v16 = vmov 0   ;;  %s402_s1 = inlined_call_operand.vmem [shape: bf16[128,128], index: 1, kind: input, shape index: {}]   ;;  %s403_s0 = inlined_call_operand.vmem [shape: bf16[16,128], index: 0, kind: input, shape index: {}]   ;;  %s404_s2 = inlined_call_operand.vmem [shape: f32[16,1], index: 2, kind: input, shape index: {}]   ;;  %s405_s3 = inlined_call_operand.vmem [shape: f32[16,1], index: 3, kind: input, shape index: {}]   ;;  %s406_s4 = inlined_call_operand.vmem [shape: bf16[16,128], index: 4, kind: output, shape index: {}]  }
   0x1   :  { %274 = vmatprep.subr.bf16.mxu0 %v312_v0  ;;  %v299_v1 = vld [vmem:[%s402_s1 + $0x38] sm:$0xff]   ;;  %290 = vmatprep.mubr.msk.bf16.mxu0 %vm313_vm0, %v312_v0  ;;  %v300_v2 = vld [vmem:[%s402_s1 + $0x30] sm:$0xff]   ;;  %v301_v3 = vld [vmem:[%s402_s1 + $0x28] sm:$0xff]   ;;  %23 = vst.msk [vmem:[#allocation3] sm:$0xff] %vm22_vm1, %v312_v0 }
   0x2   :  { %275 = vmatpush3.bf16.msra.mxu0 %v299_v1  ;;  %v302_v4 = vld [vmem:[%s402_s1 + $0x20] sm:$0xff]   ;;  %v303_v5 = vld [vmem:[%s402_s1 + $0x18] sm:$0xff]   ;;  %v304_v6 = vld [vmem:[%s402_s1 + $0x10] sm:$0xff]   ;;  %24 = vst.msk [vmem:[#allocation3 + $0x8] sm:$0xff] %vm22_vm1, %v312_v0  ;;  %297 = vset.pattern.permute.xlu0 %v314_v16 }
   0x3   :  { %276 = vmatprep.subr.bf16.mxu0 %v312_v0  ;;  %v305_v7 = vld [vmem:[%s402_s1 + $0x8] sm:$0xff]   ;;  %v306_v8 = vld [vmem:[%s402_s1] sm:$0xff]   ;;  %25 = vst.msk [vmem:[#allocation4] sm:$0xff] %vm22_vm1, %v312_v0  ;;  %26 = vst.msk [vmem:[#allocation4 + $0x8] sm:$0xff] %vm22_vm1, %v312_v0  ;;  %298 = vset.pattern.permute.xlu1 %v314_v16 }
   0x4   :  { %v307_v9 = vld [vmem:[%s403_s0] sm:$0xff]   ;;  %v187_v48 = vld [vmem:[%s404_s2 + $0x8] sm:$0xff] }
   0x5   :  { %v186_v45 = vld [vmem:[%s404_s2] sm:$0xff]  ;;  %v195_v55 = vld [vmem:[%s405_s3 + $0x8] sm:$0xff] }
   0x6   :  { %277 = vmatpush3.bf16.msra.mxu0 %v300_v2  ;;  %v194_v52 = vld [vmem:[%s405_s3] sm:$0xff] }
   0x7   :  { %278 = vmatprep.subr.bf16.mxu0 %v312_v0 }
   0x8   :  { %v146_v17 = vld [vmem:[#allocation3] sm:$0xff] }
   0x9   :  { %v147_v22 = vld [vmem:[#allocation3 + $0x8] sm:$0xff] }
   0xa   :  { %279 = vmatpush3.bf16.msra.mxu0 %v301_v3  ;;  %v157_v19 = vld [vmem:[#allocation4] sm:$0xff]  ;;  %v158_v25 = vld [vmem:[#allocation4 + $0x8] sm:$0xff] }
   0xb   :  { %280 = vmatprep.subr.bf16.mxu0 %v312_v0 }
   0xe   :  { %281 = vmatpush3.bf16.msra.mxu0 %v302_v4 }
   0xf   :  { %282 = vmatprep.subr.bf16.mxu0 %v312_v0 }
  0x12   :  { %283 = vmatpush3.bf16.msra.mxu0 %v303_v5 }
  0x13   :  { %284 = vmatprep.subr.bf16.mxu0 %v312_v0 }
  0x16   :  { %285 = vmatpush3.bf16.msra.mxu0 %v304_v6 }
  0x17   :  { %286 = vmatprep.subr.bf16.mxu0 %v312_v0 }
  0x1a   :  { %287 = vmatpush3.bf16.msra.mxu0 %v305_v7 }
  0x1b   :  { %288 = vmatprep.subr.bf16.mxu0 %v312_v0 }
  0x1e   :  { %289 = vmatpush3.bf16.msra.mxu0 %v306_v8 }
  0x21   :  { %291 = vmatmul.mubr.bf16.vlgmr.msra.gmra.mxu0 %v307_v9 }
  0xe1   :  { %v371_v10 = vpop.f32.mrf.mxu0 }
  0xe2   :  { %148 = vadd.xlane.f32.xlu0 %v371_v10  ;;  %v159_v11 = vmul.f32 %v371_v10, %v371_v10 }
  0xe3   :  { %v292_v12 = vpop.f32.mrf.mxu0 }
  0xe4   :  { %161 = vadd.xlane.f32.xlu1 %v159_v11 }
  0xe5   :  { %v376_v13 = vpop.f32.mrf.mxu0 }
  0xe6   :  { %150 = vadd.xlane.f32.xlu0 %v376_v13  ;;  %v160_v14 = vmul.f32 %v376_v13, %v376_v13 }
  0xe7   :  { %v293_v15 = vpop.f32.mrf.mxu0 }
  0xe8   :  { %163 = vadd.xlane.f32.xlu1 %v160_v14 }
 0x16b   :  { %v149_v18 = vpop.xlane.xlu0 %148 }
 0x16c   :  { %v152_v20 = vadd.f32 %v149_v18, %v146_v17 }
 0x16d   :  { %v162_v21 = vpop.xlane.xlu1 %161 }
 0x16e   :  { %155 = vst.msk [vmem:[#allocation3] sm:$0xff] %vm22_vm1, %v152_v20  ;;  %v165_v23 = vadd.f32 %v162_v21, %v157_v19 }
 0x16f   :  { %v151_v24 = vpop.xlane.xlu0 %150 }
 0x170   :  { %167 = vst.msk [vmem:[#allocation4] sm:$0xff] %vm22_vm1, %v165_v23  ;;  %v153_v26 = vadd.f32 %v151_v24, %v147_v22 }
 0x171   :  { %v164_v27 = vpop.xlane.xlu1 %163 }
 0x172   :  { %156 = vst.msk [vmem:[#allocation3 + $0x8] sm:$0xff] %vm22_vm1, %v153_v26  ;;  %v166_v28 = vadd.f32 %v164_v27, %v158_v25 }
 0x174   :  { %168 = vst.msk [vmem:[#allocation4 + $0x8] sm:$0xff] %vm22_vm1, %v166_v28 }
 0x175   :  { %v172_v29 = vld [vmem:[#allocation3] sm:$0xff] }
 0x176   :  { %v174_v30 = vmul.f32 0.03125, %v172_v29 }
 0x177   :  { %v176_v31 = vld [vmem:[#allocation4] sm:$0xff] }
 0x178   :  { %v178_v32 = vmul.f32 0.03125, %v176_v31  ;;  %v180_v33 = vmul.f32 %v174_v30, %v174_v30 }
 0x179   :  { %v173_v34 = vld [vmem:[#allocation3 + $0x8] sm:$0xff] }
 0x17a   :  { %v182_v35 = vsub.f32 %v178_v32, %v180_v33  ;;  %v175_v36 = vmul.f32 0.03125, %v173_v34 }
 0x17b   :  { %v177_v37 = vld [vmem:[#allocation4 + $0x8] sm:$0xff] }
 0x17c   :  { %v184_v38 = vmax.f32 %v182_v35, 0.0  ;;  %v179_v39 = vmul.f32 0.03125, %v177_v37  ;;  %v181_v40 = vmul.f32 %v175_v36, %v175_v36 }
 0x17e   :  { %v188_v41 = vadd.f32 1e-05, %v184_v38  ;;  %v183_v42 = vsub.f32 %v179_v39, %v181_v40 }
 0x180   :  { %308 = vrsqrt.f32 %v188_v41  ;;  %v185_v43 = vmax.f32 %v183_v42, 0.0 }
 0x182   :  { %v189_v44 = vadd.f32 1e-05, %v185_v43 }
 0x184   :  { %310 = vrsqrt.f32 %v189_v44 }
 0x18d   :  { %v309_v46 = vpop.eup %308 }
 0x18e   :  { %v192_v47 = vmul.f32 %v309_v46, %v186_v45 }
 0x190   :  { %204 = vperm.xlu0 %297, %v192_v47   ;;  %v196_v51 = vmul.f32 %v192_v47, %v174_v30 }
 0x191   :  { %v311_v49 = vpop.eup %310 }
 0x192   :  { %v193_v50 = vmul.f32 %v311_v49, %v187_v48  ;;  %v198_v53 = vsub.f32 %v194_v52, %v196_v51 }
 0x194   :  { %209 = vperm.xlu1 %298, %v193_v50   ;;  %v197_v54 = vmul.f32 %v193_v50, %v175_v36 }
 0x196   :  { %v199_v56 = vsub.f32 %v195_v55, %v197_v54 }
 0x198   :  { %216 = vperm.xlu1 %298, %v198_v53  }
 0x19c   :  { %221 = vperm.xlu1 %298, %v199_v56  }
 0x20b   :  { %v205_v57 = vpop.permute.xlu0 %204 }
 0x20c   :  { %v212_v59 = vmul.f32 %v205_v57, %v371_v10 }
 0x20f   :  { %v210_v58 = vpop.permute.xlu1 %209 }
 0x210   :  { %v213_v62 = vmul.f32 %v210_v58, %v376_v13 }
 0x213   :  { %v217_v60 = vpop.permute.xlu1 %216 }
 0x214   :  { %v224_v61 = vadd.f32 %v217_v60, %v212_v59 }
 0x216   :  { %v228_v0 = vmul.f32 0.2, %v224_v61  ;;  %vm226_vm2 = vcmp.ge.f32.partialorder %v224_v61, 0.0 }
 0x217   :  { %v222_v63 = vpop.permute.xlu1 %221 }
 0x218   :  { %v225_v1 = vadd.f32 %v222_v63, %v213_v62  ;;  %v230_v3 = vsel %vm226_vm2, %v224_v61, %v228_v0 }
 0x21a   :  { %vm227_vm3 = vcmp.ge.f32.partialorder %v225_v1, 0.0  ;;  %v229_v2 = vmul.f32 0.2, %v225_v1 }
 0x21c   :  { %v231_v4 = vsel %vm227_vm3, %v225_v1, %v229_v2 }
 0x21d   :  { %v263_v5 = vpack.c.bf16 %v231_v4, %v230_v3 }
 0x21f   :  { %264 = vst [vmem:[%s406_s4] sm:$0xff] %v263_v5  }

// kernel: discriminator_forward.6
= control target key start
LH: loop header
LB: loop body
LE: loop exit
PB: predicated region body
PF: predicated region fallthrough
CT: control target
= control target key end

     0   :  { %vm22_vm0 = vcmask 7168   ;;  %v550_v20 = vmov 0.0   ;;  %v551_v37 = vmov 0   ;;  %s707_s1 = inlined_call_operand.vmem [shape: bf16[256,128], index: 1, kind: input, shape index: {}]   ;;  %s708_s0 = inlined_call_operand.vmem [shape: bf16[32,256], index: 0, kind: input, shape index: {}]   ;;  %s709_s2 = inlined_call_operand.vmem [shape: f32[32,1], index: 2, kind: input, shape index: {}]   ;;  %s710_s3 = inlined_call_operand.vmem [shape: f32[32,1], index: 3, kind: input, shape index: {}]   ;;  %s711_s4 = inlined_call_operand.vmem [shape: bf16[32,128], index: 4, kind: output, shape index: {}]  }
   0x1   :  { %v520_v0 = vld [vmem:[%s707_s1 + $0x78] sm:$0xff]   ;;  %v522_v2 = vld [vmem:[%s707_s1 + $0x70] sm:$0xff]   ;;  %v524_v4 = vld [vmem:[%s707_s1 + $0x68] sm:$0xff]   ;;  %25 = vst.msk [vmem:[#allocation3 + $0x10] sm:$0xff] %vm22_vm0, %v550_v20  ;;  %518 = vset.pattern.permute.xlu0 %v551_v37  ;;  %519 = vset.pattern.permute.xlu1 %v551_v37 }
   0x2   :  { %v521_v1 = vld [vmem:[%s707_s1 + $0x38] sm:$0xff]   ;;  %472 = vmatprep.subr.bf16.mxu0 %v520_v0  ;;  %500 = vmatprep.subr.bf16.mxu1 %v520_v0  ;;  %v523_v3 = vld [vmem:[%s707_s1 + $0x30] sm:$0xff]   ;;  %v525_v5 = vld [vmem:[%s707_s1 + $0x28] sm:$0xff]   ;;  %23 = vst.msk [vmem:[#allocation3] sm:$0xff] %vm22_vm0, %v550_v20 }
   0x3   :  { %473 = vmatpush3.bf16.msra.mxu0 %v521_v1  ;;  %508 = vmatpush3.bf16.msra.mxu1 %v521_v1  ;;  %v526_v6 = vld [vmem:[%s707_s1 + $0x60] sm:$0xff]   ;;  %v528_v8 = vld [vmem:[%s707_s1 + $0x58] sm:$0xff]   ;;  %v530_v10 = vld [vmem:[%s707_s1 + $0x50] sm:$0xff]   ;;  %24 = vst.msk [vmem:[#allocation3 + $0x8] sm:$0xff] %vm22_vm0, %v550_v20 }
   0x4   :  { %474 = vmatprep.subr.bf16.mxu0 %v522_v2  ;;  %501 = vmatprep.subr.bf16.mxu1 %v522_v2  ;;  %v527_v7 = vld [vmem:[%s707_s1 + $0x20] sm:$0xff]   ;;  %v529_v9 = vld [vmem:[%s707_s1 + $0x18] sm:$0xff]   ;;  %v531_v13 = vld [vmem:[%s707_s1 + $0x10] sm:$0xff]   ;;  %26 = vst.msk [vmem:[#allocation3 + $0x18] sm:$0xff] %vm22_vm0, %v550_v20 }
   0x5   :  { %v538_v11 = vld [vmem:[%s708_s0 + $0x4] ss:$8 sps:$4 sm:$0xff]   ;;  %v541_v12 = vld [vmem:[%s708_s0 + $0x14] ss:$8 sps:$4 sm:$0xff]   ;;  %v536_v18 = vld [vmem:[%s708_s0] ss:$8 sps:$4 sm:$0xff]  }
   0x6   :  { %v532_v14 = vld [vmem:[%s707_s1 + $0x48] sm:$0xff]   ;;  %215 = vmatprep.mubr.bf16.mxu0 %v538_v11  ;;  %223 = vmatprep.mubr.bf16.mxu1 %v541_v12  ;;  %v534_v16 = vld [vmem:[%s707_s1 + $0x40] sm:$0xff]   ;;  %v539_v19 = vld [vmem:[%s708_s0 + $0x10] ss:$8 sps:$4 sm:$0xff]   ;;  %27 = vst.msk [vmem:[#allocation4] sm:$0xff] %vm22_vm0, %v550_v20 }
   0x7   :  { %475 = vmatpush3.bf16.msra.mxu0 %v523_v3  ;;  %509 = vmatpush3.bf16.msra.mxu1 %v523_v3  ;;  %v533_v15 = vld [vmem:[%s707_s1 + $0x8] sm:$0xff]   ;;  %v535_v17 = vld [vmem:[%s707_s1] sm:$0xff]   ;;  %28 = vst.msk [vmem:[#allocation4 + $0x8] sm:$0xff] %vm22_vm0, %v550_v20  ;;  %29 = vst.msk [vmem:[#allocation4 + $0x10] sm:$0xff] %vm22_vm0, %v550_v20 }
   0x8   :  { %476 = vmatprep.subr.bf16.mxu0 %v524_v4  ;;  %502 = vmatprep.subr.bf16.mxu1 %v524_v4  ;;  %30 = vst.msk [vmem:[#allocation4 + $0x18] sm:$0xff] %vm22_vm0, %v550_v20  ;;  %v242_v38 = vld [vmem:[#allocation3 + $0x10] sm:$0xff] }
   0x9   :  { %v240_v39 = vld [vmem:[#allocation3] sm:$0xff]  ;;  %v318_v37 = vld [vmem:[%s709_s2 + $0x10] sm:$0xff] }
   0xa   :  { %v241_v51 = vld [vmem:[#allocation3 + $0x8] sm:$0xff] }
   0xb   :  { %477 = vmatpush3.bf16.msra.mxu0 %v525_v5  ;;  %510 = vmatpush3.bf16.msra.mxu1 %v525_v5  ;;  %v243_v44 = vld [vmem:[#allocation3 + $0x18] sm:$0xff] }
   0xc   :  { %478 = vmatprep.subr.bf16.mxu0 %v526_v6  ;;  %503 = vmatprep.subr.bf16.mxu1 %v526_v6 }
   0xd   :  { %v261_v45 = vld [vmem:[#allocation4] sm:$0xff] }
   0xe   :  { %v262_v50 = vld [vmem:[#allocation4 + $0x8] sm:$0xff]  ;;  %v263_v57 = vld [vmem:[#allocation4 + $0x10] sm:$0xff] }
   0xf   :  { %479 = vmatpush3.bf16.msra.mxu0 %v527_v7  ;;  %511 = vmatpush3.bf16.msra.mxu1 %v527_v7  ;;  %v264_v56 = vld [vmem:[#allocation4 + $0x18] sm:$0xff] }
  0x10   :  { %480 = vmatprep.subr.bf16.mxu0 %v528_v8  ;;  %504 = vmatprep.subr.bf16.mxu1 %v528_v8 }
  0x13   :  { %481 = vmatpush3.bf16.msra.mxu0 %v529_v9  ;;  %512 = vmatpush3.bf16.msra.mxu1 %v529_v9 }
  0x14   :  { %482 = vmatprep.subr.bf16.mxu0 %v530_v10  ;;  %505 = vmatprep.subr.bf16.mxu1 %v530_v10 }
  0x17   :  { %483 = vmatpush3.bf16.msra.mxu0 %v531_v13  ;;  %513 = vmatpush3.bf16.msra.mxu1 %v531_v13 }
  0x18   :  { %484 = vmatprep.subr.bf16.mxu0 %v532_v14  ;;  %506 = vmatprep.subr.bf16.mxu1 %v532_v14 }
  0x1b   :  { %485 = vmatpush3.bf16.msra.mxu0 %v533_v15  ;;  %514 = vmatpush3.bf16.msra.mxu1 %v533_v15 }
  0x1c   :  { %486 = vmatprep.subr.bf16.mxu0 %v534_v16  ;;  %507 = vmatprep.subr.bf16.mxu1 %v534_v16 }
  0x1f   :  { %487 = vmatpush3.bf16.msra.mxu0 %v535_v17  ;;  %515 = vmatpush3.bf16.msra.mxu1 %v535_v17 }
  0x22   :  { %216 = vmatmul.mubr.bf16.vlgmr.msra.gmra.mxu0 %v536_v18  ;;  %224 = vmatmul.mubr.bf16.vlgmr.msra.gmra.mxu1 %v539_v19 }
  0xe2   :  { %v488_v21 = vpop.f32.mrf.mxu0  ;;  %v494_v22 = vpop.f32.mrf.mxu1 }
  0xe4   :  { %v489_v23 = vpop.f32.mrf.mxu0  ;;  %v495_v24 = vpop.f32.mrf.mxu1 }
  0xe5   :  { %v645_v25 = vadd.f32 %v489_v23, %v488_v21  ;;  %v647_v26 = vadd.f32 %v495_v24, %v494_v22 }
  0xe6   :  { %v491_v27 = vpop.f32.mrf.mxu0  ;;  %v497_v28 = vpop.f32.mrf.mxu1 }
  0xe7   :  { %248 = vadd.xlane.f32.xlu1 %v647_v26  ;;  %244 = vadd.xlane.f32.xlu0 %v645_v25  ;;  %v265_v33 = vmul.f32 %v645_v25, %v645_v25  ;;  %v267_v36 = vmul.f32 %v647_v26, %v647_v26 }
  0xe8   :  { %v492_v29 = vpop.f32.mrf.mxu0  ;;  %v498_v30 = vpop.f32.mrf.mxu1 }
  0xe9   :  { %v651_v31 = vadd.f32 %v492_v29, %v491_v27  ;;  %v653_v32 = vadd.f32 %v498_v30, %v497_v28 }
  0xeb   :  { %250 = vadd.xlane.f32.xlu1 %v653_v32  ;;  %269 = vadd.xlane.f32.xlu0 %v265_v33  ;;  %v266_v34 = vmul.f32 %v651_v31, %v651_v31  ;;  %v268_v35 = vmul.f32 %v653_v32, %v653_v32 }
  0xef   :  { %271 = vadd.xlane.f32.xlu1 %v266_v34  ;;  %246 = vadd.xlane.f32.xlu0 %v651_v31  ;;  %v316_v34 = vld [vmem:[%s709_s2] sm:$0xff] }
  0xf3   :  { %275 = vadd.xlane.f32.xlu1 %v268_v35  ;;  %273 = vadd.xlane.f32.xlu0 %v267_v36 }
 0x170   :  { %v249_v40 = vpop.xlane.xlu1 %248  ;;  %v245_v41 = vpop.xlane.xlu0 %244 }
 0x171   :  { %v254_v42 = vadd.f32 %v249_v40, %v242_v38  ;;  %v252_v43 = vadd.f32 %v245_v41, %v240_v39  ;;  %v317_v41 = vld [vmem:[%s709_s2 + $0x8] sm:$0xff] }
 0x173   :  { %259 = vst.msk [vmem:[#allocation3 + $0x10] sm:$0xff] %vm22_vm0, %v254_v42  ;;  %257 = vst.msk [vmem:[#allocation3] sm:$0xff] %vm22_vm0, %v252_v43 }
 0x174   :  { %v251_v46 = vpop.xlane.xlu1 %250  ;;  %v270_v47 = vpop.xlane.xlu0 %269 }
 0x175   :  { %v255_v48 = vadd.f32 %v251_v46, %v243_v44  ;;  %v277_v49 = vadd.f32 %v270_v47, %v261_v45  ;;  %v319_v44 = vld [vmem:[%s709_s2 + $0x18] sm:$0xff]  ;;  %v332_v47 = vld [vmem:[%s710_s3] sm:$0xff] }
 0x177   :  { %260 = vst.msk [vmem:[#allocation3 + $0x18] sm:$0xff] %vm22_vm0, %v255_v48  ;;  %281 = vst.msk [vmem:[#allocation4] sm:$0xff] %vm22_vm0, %v277_v49 }
 0x178   :  { %v272_v52 = vpop.xlane.xlu1 %271  ;;  %v247_v53 = vpop.xlane.xlu0 %246 }
 0x179   :  { %v278_v54 = vadd.f32 %v272_v52, %v262_v50  ;;  %v253_v55 = vadd.f32 %v247_v53, %v241_v51  ;;  %v334_v50 = vld [vmem:[%s710_s3 + $0x10] sm:$0xff]  ;;  %v333_v53 = vld [vmem:[%s710_s3 + $0x8] sm:$0xff] }
 0x17a   :  { %v288_v58 = vld [vmem:[#allocation3] sm:$0xff]  ;;  %v290_v3 = vld [vmem:[#allocation3 + $0x10] sm:$0xff] }
 0x17b   :  { %282 = vst.msk [vmem:[#allocation4 + $0x8] sm:$0xff] %vm22_vm0, %v278_v54  ;;  %258 = vst.msk [vmem:[#allocation3 + $0x8] sm:$0xff] %vm22_vm0, %v253_v55  ;;  %v292_v59 = vmul.f32 0.125, %v288_v58  ;;  %v294_v6 = vmul.f32 0.125, %v290_v3 }
 0x17c   :  { %v276_v60 = vpop.xlane.xlu1 %275  ;;  %v274_v61 = vpop.xlane.xlu0 %273 }
 0x17d   :  { %v280_v62 = vadd.f32 %v276_v60, %v264_v56  ;;  %v279_v63 = vadd.f32 %v274_v61, %v263_v57  ;;  %v304_v2 = vmul.f32 %v292_v59, %v292_v59  ;;  %v306_v16 = vmul.f32 %v294_v6, %v294_v6  ;;  %v335_v56 = vld [vmem:[%s710_s3 + $0x18] sm:$0xff] }
 0x17e   :  { %v296_v0 = vld [vmem:[#allocation4] sm:$0xff]  ;;  %v291_v4 = vld [vmem:[#allocation3 + $0x18] sm:$0xff] }
 0x17f   :  { %284 = vst.msk [vmem:[#allocation4 + $0x18] sm:$0xff] %vm22_vm0, %v280_v62  ;;  %283 = vst.msk [vmem:[#allocation4 + $0x10] sm:$0xff] %vm22_vm0, %v279_v63  ;;  %v300_v1 = vmul.f32 0.125, %v296_v0  ;;  %v295_v9 = vmul.f32 0.125, %v291_v4 }
 0x181   :  { %v308_v5 = vsub.f32 %v300_v1, %v304_v2  ;;  %v307_v18 = vmul.f32 %v295_v9, %v295_v9 }
 0x182   :  { %v289_v7 = vld [vmem:[#allocation3 + $0x8] sm:$0xff] }
 0x183   :  { %v297_v8 = vld [vmem:[#allocation4 + $0x8] sm:$0xff]  ;;  %v312_v10 = vmax.f32 %v308_v5, 0.0  ;;  %v293_v11 = vmul.f32 0.125, %v289_v7 }
 0x184   :  { %v301_v13 = vmul.f32 0.125, %v297_v8 }
 0x185   :  { %v320_v12 = vadd.f32 1e-05, %v312_v10  ;;  %v305_v14 = vmul.f32 %v293_v11, %v293_v11 }
 0x186   :  { %v298_v15 = vld [vmem:[#allocation4 + $0x10] sm:$0xff]  ;;  %v299_v17 = vld [vmem:[#allocation4 + $0x18] sm:$0xff] }
 0x187   :  { %542 = vrsqrt.f32 %v320_v12  ;;  %v302_v19 = vmul.f32 0.125, %v298_v15  ;;  %v309_v20 = vsub.f32 %v301_v13, %v305_v14  ;;  %v303_v21 = vmul.f32 0.125, %v299_v17 }
 0x189   :  { %v310_v22 = vsub.f32 %v302_v19, %v306_v16  ;;  %v313_v23 = vmax.f32 %v309_v20, 0.0  ;;  %v311_v24 = vsub.f32 %v303_v21, %v307_v18 }
 0x18b   :  { %v314_v27 = vmax.f32 %v310_v22, 0.0  ;;  %v321_v29 = vadd.f32 1e-05, %v313_v23  ;;  %v315_v30 = vmax.f32 %v311_v24, 0.0 }
 0x18d   :  { %v322_v28 = vadd.f32 1e-05, %v314_v27  ;;  %v323_v33 = vadd.f32 1e-05, %v315_v30 }
 0x18f   :  { %544 = vrsqrt.f32 %v322_v28 }
 0x190   :  { %546 = vrsqrt.f32 %v321_v29 }
 0x191   :  { %548 = vrsqrt.f32 %v323_v33 }
 0x194   :  { %v543_v35 = vpop.eup %542 }
 0x195   :  { %v328_v36 = vmul.f32 %v543_v35, %v316_v34 }
 0x197   :  { %350 = vperm.xlu0 %518, %v328_v36   ;;  %v336_v46 = vmul.f32 %v328_v36, %v292_v59 }
 0x199   :  { %v340_v48 = vsub.f32 %v332_v47, %v336_v46 }
 0x19c   :  { %v545_v38 = vpop.eup %544 }
 0x19d   :  { %v330_v39 = vmul.f32 %v545_v38, %v318_v37  ;;  %v547_v40 = vpop.eup %546 }
 0x19e   :  { %v329_v42 = vmul.f32 %v547_v40, %v317_v41  ;;  %v549_v43 = vpop.eup %548 }
 0x19f   :  { %360 = vperm.xlu1 %519, %v330_v39   ;;  %v331_v45 = vmul.f32 %v549_v43, %v319_v44  ;;  %v338_v49 = vmul.f32 %v330_v39, %v294_v6 }
 0x1a0   :  { %v337_v52 = vmul.f32 %v329_v42, %v293_v11 }
 0x1a1   :  { %v342_v51 = vsub.f32 %v334_v50, %v338_v49  ;;  %v339_v55 = vmul.f32 %v331_v45, %v295_v9 }
 0x1a2   :  { %v341_v54 = vsub.f32 %v333_v53, %v337_v52 }
 0x1a3   :  { %355 = vperm.xlu1 %519, %v329_v42   ;;  %v343_v57 = vsub.f32 %v335_v56, %v339_v55 }
 0x1a7   :  { %365 = vperm.xlu1 %519, %v331_v45  }
 0x1ab   :  { %374 = vperm.xlu1 %519, %v340_v48  }
 0x1af   :  { %384 = vperm.xlu1 %519, %v342_v51  }
 0x1b3   :  { %379 = vperm.xlu1 %519, %v341_v54  }
 0x1b7   :  { %389 = vperm.xlu1 %519, %v343_v57  }
 0x212   :  { %v351_v61 = vpop.permute.xlu0 %350 }
 0x213   :  { %v368_v63 = vmul.f32 %v645_v25, %v351_v61 }
 0x21a   :  { %v361_v58 = vpop.permute.xlu1 %360 }
 0x21b   :  { %v370_v2 = vmul.f32 %v647_v26, %v361_v58 }
 0x21e   :  { %v356_v59 = vpop.permute.xlu1 %355 }
 0x21f   :  { %v369_v3 = vmul.f32 %v651_v31, %v356_v59 }
 0x222   :  { %v366_v60 = vpop.permute.xlu1 %365 }
 0x223   :  { %v371_v8 = vmul.f32 %v653_v32, %v366_v60 }
 0x226   :  { %v375_v62 = vpop.permute.xlu1 %374 }
 0x227   :  { %v392_v1 = vadd.f32 %v375_v62, %v368_v63 }
 0x229   :  { %v400_v5 = vmul.f32 0.2, %v392_v1  ;;  %vm396_vm1 = vcmp.ge.f32.partialorder %v392_v1, 0.0 }
 0x22a   :  { %v385_v0 = vpop.permute.xlu1 %384 }
 0x22b   :  { %v394_v6 = vadd.f32 %v385_v0, %v370_v2  ;;  %v404_v11 = vsel %vm396_vm1, %v392_v1, %v400_v5 }
 0x22d   :  { %v402_v12 = vmul.f32 0.2, %v394_v6  ;;  %vm398_vm3 = vcmp.ge.f32.partialorder %v394_v6, 0.0 }
 0x22e   :  { %v380_v4 = vpop.permute.xlu1 %379 }
 0x22f   :  { %v393_v7 = vadd.f32 %v380_v4, %v369_v3  ;;  %v406_v31 = vsel %vm398_vm3, %v394_v6, %v402_v12 }
 0x231   :  { %vm397_vm2 = vcmp.ge.f32.partialorder %v393_v7, 0.0  ;;  %v401_v9 = vmul.f32 0.2, %v393_v7 }
 0x232   :  { %v390_v10 = vpop.permute.xlu1 %389 }
 0x233   :  { %v405_v13 = vsel %vm397_vm2, %v393_v7, %v401_v9  ;;  %v395_v25 = vadd.f32 %v390_v10, %v371_v8 }
 0x234   :  { %v464_v14 = vpack.c.bf16 %v405_v13, %v404_v11 }
 0x235   :  { %vm399_vm4 = vcmp.ge.f32.partialorder %v395_v25, 0.0  ;;  %v403_v26 = vmul.f32 0.2, %v395_v25 }
 0x236   :  { %465 = vst [vmem:[%s711_s4] sm:$0xff] %v464_v14  }
 0x237   :  { %v407_v15 = vsel %vm399_vm4, %v395_v25, %v403_v26 }
 0x238   :  { %v469_v16 = vpack.c.bf16 %v407_v15, %v406_v31 }
 0x23a   :  { %471 = vst [vmem:[%s711_s4 + $0x8] sm:$0xff] %v469_v16  }

// kernel: discriminator_forward.7
= control target key start
LH: loop header
LB: loop body
LE: loop exit
PB: predicated region body
PF: predicated region fallthrough
CT: control target
= control target key end

     0   :  { %vm22_vm0 = vcmask 7168   ;;  %v1153_v48 = vmov 0.0   ;;  %s1504_s1 = inlined_call_operand.vmem [shape: bf16[512,128], index: 1, kind: input, shape index: {}]   ;;  %s1505_s0 = inlined_call_operand.vmem [shape: bf16[64,512], index: 0, kind: input, shape index: {}]   ;;  %s1506_s2 = inlined_call_operand.vmem [shape: f32[64,1], index: 2, kind: input, shape index: {}]   ;;  %s1507_s3 = inlined_call_operand.vmem [shape: f32[64,1], index: 3, kind: input, shape index: {}]   ;;  %s1508_s4 = inlined_call_operand.vmem [shape: bf16[64,128], index: 4, kind: output, shape index: {}]  }
   0x1   :  { %v1081_v0 = vld [vmem:[%s1504_s1 + $0x78] sm:$0xff]   ;;  %v1085_v4 = vld [vmem:[%s1504_s1 + $0x70] sm:$0xff]   ;;  %v1089_v8 = vld [vmem:[%s1504_s1 + $0x68] sm:$0xff]   ;;  %23 = vst.msk [vmem:[#allocation3] sm:$0xff] %vm22_vm0, %v1153_v48 }
   0x2   :  { %v1082_v1 = vld [vmem:[%s1504_s1 + $0xf8] sm:$0xff]   ;;  %997 = vmatprep.subr.bf16.mxu0 %v1081_v0  ;;  %v1086_v5 = vld [vmem:[%s1504_s1 + $0xf0] sm:$0xff]   ;;  %v1090_v9 = vld [vmem:[%s1504_s1 + $0xe8] sm:$0xff]   ;;  %24 = vst.msk [vmem:[#allocation3 + $0x8] sm:$0xff] %vm22_vm0, %v1153_v48 }
   0x3   :  { %v1083_v2 = vld [vmem:[%s1504_s1 + $0x38] sm:$0xff]   ;;  %1037 = vmatprep.subr.bf16.mxu1 %v1082_v1  ;;  %v1087_v6 = vld [vmem:[%s1504_s1 + $0x30] sm:$0xff]   ;;  %v1091_v10 = vld [vmem:[%s1504_s1 + $0x28] sm:$0xff]   ;;  %25 = vst.msk [vmem:[#allocation3 + $0x10] sm:$0xff] %vm22_vm0, %v1153_v48 }
   0x4   :  { %v1084_v3 = vld [vmem:[%s1504_s1 + $0xb8] sm:$0xff]   ;;  %998 = vmatpush3.bf16.msra.mxu0 %v1083_v2  ;;  %v1088_v7 = vld [vmem:[%s1504_s1 + $0xb0] sm:$0xff]   ;;  %v1092_v11 = vld [vmem:[%s1504_s1 + $0xa8] sm:$0xff]   ;;  %26 = vst.msk [vmem:[#allocation3 + $0x18] sm:$0xff] %vm22_vm0, %v1153_v48 }
   0x5   :  { %1038 = vmatpush3.bf16.msra.mxu1 %v1084_v3  ;;  %999 = vmatprep.subr.bf16.mxu0 %v1085_v4  ;;  %v1093_v12 = vld [vmem:[%s1504_s1 + $0x60] sm:$0xff]   ;;  %v1097_v16 = vld [vmem:[%s1504_s1 + $0x58] sm:$0xff]   ;;  %v1101_v20 = vld [vmem:[%s1504_s1 + $0x50] sm:$0xff]   ;;  %27 = vst.msk [vmem:[#allocation3 + $0x20] sm:$0xff] %vm22_vm0, %v1153_v48 }
   0x6   :  { %1039 = vmatprep.subr.bf16.mxu1 %v1086_v5  ;;  %v1094_v13 = vld [vmem:[%s1504_s1 + $0xe0] sm:$0xff]   ;;  %v1098_v17 = vld [vmem:[%s1504_s1 + $0xd8] sm:$0xff]   ;;  %v1102_v21 = vld [vmem:[%s1504_s1 + $0xd0] sm:$0xff]   ;;  %28 = vst.msk [vmem:[#allocation3 + $0x28] sm:$0xff] %vm22_vm0, %v1153_v48 }
   0x7   :  { %v1095_v14 = vld [vmem:[%s1504_s1 + $0x20] sm:$0xff]   ;;  %v1099_v18 = vld [vmem:[%s1504_s1 + $0x18] sm:$0xff]   ;;  %v1103_v22 = vld [vmem:[%s1504_s1 + $0x10] sm:$0xff]   ;;  %29 = vst.msk [vmem:[#allocation3 + $0x30] sm:$0xff] %vm22_vm0, %v1153_v48 }
   0x8   :  { %1000 = vmatpush3.bf16.msra.mxu0 %v1087_v6  ;;  %v1096_v15 = vld [vmem:[%s1504_s1 + $0xa0] sm:$0xff]   ;;  %v1100_v19 = vld [vmem:[%s1504_s1 + $0x98] sm:$0xff]   ;;  %v1104_v23 = vld [vmem:[%s1504_s1 + $0x90] sm:$0xff]   ;;  %30 = vst.msk [vmem:[#allocation3 + $0x38] sm:$0xff] %vm22_vm0, %v1153_v48 }
   0x9   :  { %1040 = vmatpush3.bf16.msra.mxu1 %v1088_v7  ;;  %1001 = vmatprep.subr.bf16.mxu0 %v1089_v8  ;;  %v1105_v24 = vld [vmem:[%s1504_s1 + $0x48] sm:$0xff]   ;;  %v1109_v28 = vld [vmem:[%s1504_s1 + $0x40] sm:$0xff]   ;;  %31 = vst.msk [vmem:[#allocation4] sm:$0xff] %vm22_vm0, %v1153_v48  ;;  %32 = vst.msk [vmem:[#allocation4 + $0x8] sm:$0xff] %vm22_vm0, %v1153_v48 }
   0xa   :  { %1041 = vmatprep.subr.bf16.mxu1 %v1090_v9  ;;  %v1106_v25 = vld [vmem:[%s1504_s1 + $0xc8] sm:$0xff]   ;;  %v1110_v29 = vld [vmem:[%s1504_s1 + $0xc0] sm:$0xff]   ;;  %33 = vst.msk [vmem:[#allocation4 + $0x10] sm:$0xff] %vm22_vm0, %v1153_v48  ;;  %34 = vst.msk [vmem:[#allocation4 + $0x18] sm:$0xff] %vm22_vm0, %v1153_v48 }
   0xb   :  { %v1107_v26 = vld [vmem:[%s1504_s1 + $0x8] sm:$0xff]   ;;  %v1111_v30 = vld [vmem:[%s1504_s1] sm:$0xff]   ;;  %35 = vst.msk [vmem:[#allocation4 + $0x20] sm:$0xff] %vm22_vm0, %v1153_v48  ;;  %36 = vst.msk [vmem:[#allocation4 + $0x28] sm:$0xff] %vm22_vm0, %v1153_v48 }
   0xc   :  { %1002 = vmatpush3.bf16.msra.mxu0 %v1091_v10  ;;  %v1108_v27 = vld [vmem:[%s1504_s1 + $0x88] sm:$0xff]   ;;  %v1112_v31 = vld [vmem:[%s1504_s1 + $0x80] sm:$0xff]   ;;  %37 = vst.msk [vmem:[#allocation4 + $0x30] sm:$0xff] %vm22_vm0, %v1153_v48  ;;  %38 = vst.msk [vmem:[#allocation4 + $0x38] sm:$0xff] %vm22_vm0, %v1153_v48 }
   0xd   :  { %1042 = vmatpush3.bf16.msra.mxu1 %v1092_v11  ;;  %1003 = vmatprep.subr.bf16.mxu0 %v1093_v12  ;;  %v1113_v32 = vld [vmem:[%s1505_s0] ss:$16 sps:$4 sm:$0xff]   ;;  %v1115_v33 = vld [vmem:[%s1505_s0 + $0x4] ss:$16 sps:$4 sm:$0xff]   ;;  %v1116_v34 = vld [vmem:[%s1505_s0 + $0x8] ss:$16 sps:$4 sm:$0xff]  }
   0xe   :  { %1043 = vmatprep.subr.bf16.mxu1 %v1094_v13  ;;  %v1118_v35 = vld [vmem:[%s1505_s0 + $0xc] ss:$16 sps:$4 sm:$0xff]   ;;  %423 = vmatprep.mubr.bf16.mxu0 %v1115_v33  ;;  %v1119_v36 = vld [vmem:[%s1505_s0 + $0x24] ss:$16 sps:$4 sm:$0xff]   ;;  %v1123_v38 = vld [vmem:[%s1505_s0 + $0x20] ss:$16 sps:$4 sm:$0xff]  }
   0xf   :  { %488 = vmatprep.mubr.bf16.mxu1 %v1118_v35  ;;  %v1121_v37 = vld [vmem:[%s1505_s0 + $0x2c] ss:$16 sps:$4 sm:$0xff]   ;;  %v1124_v39 = vld [vmem:[%s1505_s0 + $0x28] ss:$16 sps:$4 sm:$0xff]   ;;  %v1125_v40 = vld [vmem:[%s1505_s0 + $0x44] ss:$16 sps:$4 sm:$0xff]  }
  0x10   :  { %1004 = vmatpush3.bf16.msra.mxu0 %v1095_v14  ;;  %v1127_v41 = vld [vmem:[%s1505_s0 + $0x4c] ss:$16 sps:$4 sm:$0xff]   ;;  %v1129_v42 = vld [vmem:[%s1505_s0 + $0x40] ss:$16 sps:$4 sm:$0xff]   ;;  %v1130_v43 = vld [vmem:[%s1505_s0 + $0x48] ss:$16 sps:$4 sm:$0xff]  }
  0x11   :  { %1044 = vmatpush3.bf16.msra.mxu1 %v1096_v15  ;;  %1005 = vmatprep.subr.bf16.mxu0 %v1097_v16  ;;  %v1131_v44 = vld [vmem:[%s1505_s0 + $0x64] ss:$16 sps:$4 sm:$0xff]   ;;  %v1133_v45 = vld [vmem:[%s1505_s0 + $0x6c] ss:$16 sps:$4 sm:$0xff]   ;;  %v1135_v46 = vld [vmem:[%s1505_s0 + $0x60] ss:$16 sps:$4 sm:$0xff]  }
  0x12   :  { %1045 = vmatprep.subr.bf16.mxu1 %v1098_v17  ;;  %v1136_v47 = vld [vmem:[%s1505_s0 + $0x68] ss:$16 sps:$4 sm:$0xff]  }
  0x14   :  { %1006 = vmatpush3.bf16.msra.mxu0 %v1099_v18 }
  0x15   :  { %1046 = vmatpush3.bf16.msra.mxu1 %v1100_v19  ;;  %1007 = vmatprep.subr.bf16.mxu0 %v1101_v20 }
  0x16   :  { %1047 = vmatprep.subr.bf16.mxu1 %v1102_v21 }
  0x18   :  { %1008 = vmatpush3.bf16.msra.mxu0 %v1103_v22 }
  0x19   :  { %1048 = vmatpush3.bf16.msra.mxu1 %v1104_v23  ;;  %1009 = vmatprep.subr.bf16.mxu0 %v1105_v24 }
  0x1a   :  { %1049 = vmatprep.subr.bf16.mxu1 %v1106_v25 }
  0x1c   :  { %1010 = vmatpush3.bf16.msra.mxu0 %v1107_v26 }
  0x1d   :  { %1050 = vmatpush3.bf16.msra.mxu1 %v1108_v27  ;;  %1011 = vmatprep.subr.bf16.mxu0 %v1109_v28 }
  0x1e   :  { %1051 = vmatprep.subr.bf16.mxu1 %v1110_v29 }
  0x20   :  { %1012 = vmatpush3.bf16.msra.mxu0 %v1111_v30 }
  0x21   :  { %1052 = vmatpush3.bf16.msra.mxu1 %v1112_v31 }
  0x23   :  { %424 = vmatmul.mubr.bf16.vlgmr.msra.gmra.mxu0 %v1113_v32 }
  0x24   :  { %489 = vmatmul.mubr.bf16.vlgmr.msra.gmra.mxu1 %v1116_v34  ;;  %431 = vmatprep.mubr.bf16.mxu0 %v1119_v36 }
  0x25   :  { %496 = vmatprep.mubr.bf16.mxu1 %v1121_v37 }
  0x2b   :  { %432 = vmatmul.mubr.bf16.gmra.mxu0 %v1123_v38 }
  0x2c   :  { %497 = vmatmul.mubr.bf16.gmra.mxu1 %v1124_v39  ;;  %439 = vmatprep.mubr.bf16.mxu0 %v1125_v40 }
  0x2d   :  { %504 = vmatprep.mubr.bf16.mxu1 %v1127_v41 }
  0x33   :  { %440 = vmatmul.mubr.bf16.gmra.mxu0 %v1129_v42 }
  0x34   :  { %505 = vmatmul.mubr.bf16.gmra.mxu1 %v1130_v43  ;;  %447 = vmatprep.mubr.bf16.mxu0 %v1131_v44 }
  0x35   :  { %512 = vmatprep.mubr.bf16.mxu1 %v1133_v45 }
  0x3b   :  { %448 = vmatmul.mubr.bf16.gmra.mxu0 %v1135_v46 }
  0x3c   :  { %513 = vmatmul.mubr.bf16.gmra.mxu1 %v1136_v47 }
  0xe3   :  { %v1013_v49 = vpop.f32.mrf.mxu0 }
  0xe4   :  { %v1053_v50 = vpop.f32.mrf.mxu1 }
  0xe5   :  { %v1014_v51 = vpop.f32.mrf.mxu0 }
  0xe6   :  { %v1015_v52 = vadd.f32 %v1014_v51, %v1013_v49  ;;  %v1054_v53 = vpop.f32.mrf.mxu1  ;;  %v1154_v49 = vmov 0  }
  0xe7   :  { %v1055_v54 = vadd.f32 %v1054_v53, %v1053_v50  ;;  %v1016_v55 = vpop.f32.mrf.mxu0  ;;  %1079 = vset.pattern.permute.xlu0 %v1154_v49  ;;  %1080 = vset.pattern.permute.xlu1 %v1154_v49  ;;  %v533_v50 = vld [vmem:[#allocation3] sm:$0xff] }
  0xe8   :  { %v1056_v56 = vpop.f32.mrf.mxu1  ;;  %v574_v53 = vld [vmem:[#allocation4] sm:$0xff] }
  0xe9   :  { %v1340_v57 = vadd.f32 %v1055_v54, %v1015_v52  ;;  %v1017_v58 = vpop.f32.mrf.mxu0 }
  0xea   :  { %v1018_v59 = vadd.f32 %v1017_v58, %v1016_v55  ;;  %v1057_v60 = vpop.f32.mrf.mxu1  ;;  %v575_v55 = vld [vmem:[#allocation4 + $0x8] sm:$0xff] }
  0xeb   :  { %v1058_v61 = vadd.f32 %v1057_v60, %v1056_v56  ;;  %541 = vadd.xlane.f32.xlu0 %v1340_v57  ;;  %v1019_v62 = vpop.f32.mrf.mxu0  ;;  %v582_v2 = vmul.f32 %v1340_v57, %v1340_v57 }
  0xec   :  { %v1059_v63 = vpop.f32.mrf.mxu1 }
  0xed   :  { %v1343_v0 = vadd.f32 %v1058_v61, %v1018_v59  ;;  %v1020_v1 = vpop.f32.mrf.mxu0  ;;  %v534_v59 = vld [vmem:[#allocation3 + $0x8] sm:$0xff] }
  0xee   :  { %v1021_v3 = vadd.f32 %v1020_v1, %v1019_v62  ;;  %v1060_v4 = vpop.f32.mrf.mxu1  ;;  %v535_v62 = vld [vmem:[#allocation3 + $0x10] sm:$0xff] }
  0xef   :  { %v1061_v5 = vadd.f32 %v1060_v4, %v1059_v63  ;;  %590 = vadd.xlane.f32.xlu0 %v582_v2  ;;  %v1022_v6 = vpop.f32.mrf.mxu0  ;;  %v583_v7 = vmul.f32 %v1343_v0, %v1343_v0  ;;  %v576_v2 = vld [vmem:[#allocation4 + $0x10] sm:$0xff] }
  0xf0   :  { %v1062_v8 = vpop.f32.mrf.mxu1 }
  0xf1   :  { %v1349_v9 = vadd.f32 %v1061_v5, %v1021_v3  ;;  %592 = vadd.xlane.f32.xlu1 %v583_v7  ;;  %v1023_v10 = vpop.f32.mrf.mxu0  ;;  %v536_v7 = vld [vmem:[#allocation3 + $0x18] sm:$0xff] }
  0xf2   :  { %v1063_v11 = vpop.f32.mrf.mxu1  ;;  %v1024_v12 = vadd.f32 %v1023_v10, %v1022_v6 }
  0xf3   :  { %v1064_v13 = vadd.f32 %v1063_v11, %v1062_v8  ;;  %543 = vadd.xlane.f32.xlu0 %v1343_v0  ;;  %v1025_v14 = vpop.f32.mrf.mxu0  ;;  %v584_v15 = vmul.f32 %v1349_v9, %v1349_v9  ;;  %v537_v11 = vld [vmem:[#allocation3 + $0x20] sm:$0xff] }
  0xf4   :  { %v1065_v16 = vpop.f32.mrf.mxu1 }
  0xf5   :  { %545 = vadd.xlane.f32.xlu1 %v1349_v9  ;;  %v1026_v17 = vpop.f32.mrf.mxu0  ;;  %v1355_v20 = vadd.f32 %v1064_v13, %v1024_v12 }
  0xf6   :  { %v1027_v18 = vadd.f32 %v1026_v17, %v1025_v14  ;;  %v1066_v19 = vpop.f32.mrf.mxu1  ;;  %v577_v17 = vld [vmem:[#allocation4 + $0x18] sm:$0xff] }
  0xf7   :  { %v1067_v21 = vadd.f32 %v1066_v19, %v1065_v16  ;;  %594 = vadd.xlane.f32.xlu0 %v584_v15  ;;  %v1028_v22 = vpop.f32.mrf.mxu0  ;;  %v585_v30 = vmul.f32 %v1355_v20, %v1355_v20 }
  0xf8   :  { %v1068_v23 = vpop.f32.mrf.mxu1 }
  0xf9   :  { %v1357_v24 = vadd.f32 %v1067_v21, %v1027_v18  ;;  %547 = vadd.xlane.f32.xlu1 %v1355_v20  ;;  %v1029_v25 = vpop.f32.mrf.mxu0 }
  0xfa   :  { %v1030_v26 = vadd.f32 %v1029_v25, %v1028_v22  ;;  %v1069_v27 = vpop.f32.mrf.mxu1 }
  0xfb   :  { %v1070_v28 = vadd.f32 %v1069_v27, %v1068_v23  ;;  %549 = vadd.xlane.f32.xlu0 %v1357_v24  ;;  %v1031_v29 = vpop.f32.mrf.mxu0  ;;  %v586_v31 = vmul.f32 %v1357_v24, %v1357_v24  ;;  %v578_v23 = vld [vmem:[#allocation4 + $0x20] sm:$0xff] }
  0xfc   :  { %v1071_v32 = vpop.f32.mrf.mxu1 }
  0xfd   :  { %v1365_v33 = vadd.f32 %v1070_v28, %v1030_v26  ;;  %596 = vadd.xlane.f32.xlu1 %v585_v30  ;;  %v1032_v34 = vpop.f32.mrf.mxu0  ;;  %v538_v30 = vld [vmem:[#allocation3 + $0x28] sm:$0xff] }
  0xfe   :  { %v1033_v35 = vadd.f32 %v1032_v34, %v1031_v29  ;;  %v1072_v36 = vpop.f32.mrf.mxu1 }
  0xff   :  { %v1073_v37 = vadd.f32 %v1072_v36, %v1071_v32  ;;  %598 = vadd.xlane.f32.xlu0 %v586_v31  ;;  %v1034_v38 = vpop.f32.mrf.mxu0  ;;  %v587_v42 = vmul.f32 %v1365_v33, %v1365_v33 }
 0x100   :  { %v1074_v39 = vpop.f32.mrf.mxu1 }
 0x101   :  { %v1367_v40 = vadd.f32 %v1073_v37, %v1033_v35  ;;  %551 = vadd.xlane.f32.xlu1 %v1365_v33  ;;  %v1035_v41 = vpop.f32.mrf.mxu0 }
 0x102   :  { %v1036_v43 = vadd.f32 %v1035_v41, %v1034_v38  ;;  %v1075_v44 = vpop.f32.mrf.mxu1 }
 0x103   :  { %553 = vadd.xlane.f32.xlu0 %v1367_v40  ;;  %v1076_v45 = vadd.f32 %v1075_v44, %v1074_v39  ;;  %v588_v46 = vmul.f32 %v1367_v40, %v1367_v40  ;;  %v539_v39 = vld [vmem:[#allocation3 + $0x30] sm:$0xff] }
 0x105   :  { %v1375_v47 = vadd.f32 %v1076_v45, %v1036_v43  ;;  %600 = vadd.xlane.f32.xlu1 %v587_v42 }
 0x107   :  { %602 = vadd.xlane.f32.xlu0 %v588_v46  ;;  %v589_v48 = vmul.f32 %v1375_v47, %v1375_v47  ;;  %v579_v46 = vld [vmem:[#allocation4 + $0x28] sm:$0xff] }
 0x109   :  { %555 = vadd.xlane.f32.xlu1 %v1375_v47 }
 0x10d   :  { %604 = vadd.xlane.f32.xlu1 %v589_v48 }
 0x174   :  { %v542_v51 = vpop.xlane.xlu0 %541 }
 0x175   :  { %v557_v52 = vadd.f32 %v542_v51, %v533_v50 }
 0x177   :  { %566 = vst.msk [vmem:[#allocation3] sm:$0xff] %vm22_vm0, %v557_v52 }
 0x178   :  { %v591_v54 = vpop.xlane.xlu0 %590 }
 0x179   :  { %v606_v56 = vadd.f32 %v591_v54, %v574_v53  ;;  %v580_v54 = vld [vmem:[#allocation4 + $0x30] sm:$0xff] }
 0x17a   :  { %v593_v58 = vpop.xlane.xlu1 %592 }
 0x17b   :  { %614 = vst.msk [vmem:[#allocation4] sm:$0xff] %vm22_vm0, %v606_v56  ;;  %v607_v60 = vadd.f32 %v593_v58, %v575_v55 }
 0x17c   :  { %v544_v61 = vpop.xlane.xlu0 %543 }
 0x17d   :  { %615 = vst.msk [vmem:[#allocation4 + $0x8] sm:$0xff] %vm22_vm0, %v607_v60  ;;  %v558_v63 = vadd.f32 %v544_v61, %v534_v59 }
 0x17e   :  { %v546_v1 = vpop.xlane.xlu1 %545  ;;  %v625_v3 = vld [vmem:[#allocation3] sm:$0xff] }
 0x17f   :  { %567 = vst.msk [vmem:[#allocation3 + $0x8] sm:$0xff] %vm22_vm0, %v558_v63  ;;  %v559_v4 = vadd.f32 %v546_v1, %v535_v62  ;;  %v1384_v5 = vmul.f32 0.5, %v625_v3  ;;  %v540_v62 = vld [vmem:[#allocation3 + $0x38] sm:$0xff] }
 0x180   :  { %v595_v6 = vpop.xlane.xlu0 %594 }
 0x181   :  { %568 = vst.msk [vmem:[#allocation3 + $0x10] sm:$0xff] %vm22_vm0, %v559_v4  ;;  %v608_v8 = vadd.f32 %v595_v6, %v576_v2  ;;  %v657_v15 = vmul.f32 %v1384_v5, %v1384_v5 }
 0x182   :  { %v548_v10 = vpop.xlane.xlu1 %547  ;;  %v641_v12 = vld [vmem:[#allocation4] sm:$0xff] }
 0x183   :  { %616 = vst.msk [vmem:[#allocation4 + $0x10] sm:$0xff] %vm22_vm0, %v608_v8  ;;  %v560_v13 = vadd.f32 %v548_v10, %v536_v7  ;;  %v649_v14 = vmul.f32 0.5, %v641_v12 }
 0x184   :  { %v550_v16 = vpop.xlane.xlu0 %549  ;;  %v642_v21 = vld [vmem:[#allocation4 + $0x8] sm:$0xff] }
 0x185   :  { %569 = vst.msk [vmem:[#allocation3 + $0x18] sm:$0xff] %vm22_vm0, %v560_v13  ;;  %v561_v18 = vadd.f32 %v550_v16, %v537_v11  ;;  %v665_v19 = vsub.f32 %v649_v14, %v657_v15  ;;  %v650_v31 = vmul.f32 0.5, %v642_v21  ;;  %v581_v14 = vld [vmem:[#allocation4 + $0x38] sm:$0xff] }
 0x186   :  { %v597_v22 = vpop.xlane.xlu1 %596  ;;  %v626_v25 = vld [vmem:[#allocation3 + $0x8] sm:$0xff] }
 0x187   :  { %570 = vst.msk [vmem:[#allocation3 + $0x20] sm:$0xff] %vm22_vm0, %v561_v18  ;;  %v609_v26 = vadd.f32 %v597_v22, %v577_v17  ;;  %v673_v27 = vmax.f32 %v665_v19, 0.0  ;;  %v1392_v28 = vmul.f32 0.5, %v626_v25  ;;  %v681_v19 = vld [vmem:[%s1506_s2] sm:$0xff] }
 0x188   :  { %v599_v29 = vpop.xlane.xlu0 %598  ;;  %v627_v32 = vld [vmem:[#allocation3 + $0x10] sm:$0xff] }
 0x189   :  { %617 = vst.msk [vmem:[#allocation4 + $0x18] sm:$0xff] %vm22_vm0, %v609_v26  ;;  %v610_v34 = vadd.f32 %v599_v29, %v578_v23  ;;  %v689_v35 = vadd.f32 1e-05, %v673_v27  ;;  %v658_v36 = vmul.f32 %v1392_v28, %v1392_v28  ;;  %v1397_v37 = vmul.f32 0.5, %v627_v32 }
 0x18a   :  { %v552_v38 = vpop.xlane.xlu1 %551  ;;  %v643_v41 = vld [vmem:[#allocation4 + $0x10] sm:$0xff] }
 0x18b   :  { %618 = vst.msk [vmem:[#allocation4 + $0x20] sm:$0xff] %vm22_vm0, %v610_v34  ;;  %v562_v42 = vadd.f32 %v552_v38, %v538_v30  ;;  %1137 = vrsqrt.f32 %v689_v35  ;;  %v666_v43 = vsub.f32 %v650_v31, %v658_v36  ;;  %v651_v44 = vmul.f32 0.5, %v643_v41  ;;  %v682_v36 = vld [vmem:[%s1506_s2 + $0x8] sm:$0xff] }
 0x18c   :  { %v554_v45 = vpop.xlane.xlu0 %553  ;;  %v659_v48 = vmul.f32 %v1397_v37, %v1397_v37  ;;  %v628_v49 = vld [vmem:[#allocation3 + $0x18] sm:$0xff] }
 0x18d   :  { %571 = vst.msk [vmem:[#allocation3 + $0x28] sm:$0xff] %vm22_vm0, %v562_v42  ;;  %v563_v50 = vadd.f32 %v554_v45, %v539_v39  ;;  %v674_v51 = vmax.f32 %v666_v43, 0.0  ;;  %v1403_v52 = vmul.f32 0.5, %v628_v49 }
 0x18e   :  { %v601_v53 = vpop.xlane.xlu1 %600  ;;  %v667_v55 = vsub.f32 %v651_v44, %v659_v48  ;;  %v629_v56 = vld [vmem:[#allocation3 + $0x20] sm:$0xff] }
 0x18f   :  { %572 = vst.msk [vmem:[#allocation3 + $0x30] sm:$0xff] %vm22_vm0, %v563_v50  ;;  %v611_v58 = vadd.f32 %v601_v53, %v579_v46  ;;  %v690_v59 = vadd.f32 1e-05, %v674_v51  ;;  %v1406_v60 = vmul.f32 0.5, %v629_v56  ;;  %v660_v4 = vmul.f32 %v1403_v52, %v1403_v52  ;;  %v713_v53 = vld [vmem:[%s1507_s3] sm:$0xff] }
 0x190   :  { %v603_v61 = vpop.xlane.xlu0 %602  ;;  %v675_v63 = vmax.f32 %v667_v55, 0.0  ;;  %v644_v1 = vld [vmem:[#allocation4 + $0x18] sm:$0xff] }
 0x191   :  { %619 = vst.msk [vmem:[#allocation4 + $0x28] sm:$0xff] %vm22_vm0, %v611_v58  ;;  %v612_v2 = vadd.f32 %v603_v61, %v580_v54  ;;  %1139 = vrsqrt.f32 %v690_v59  ;;  %v652_v3 = vmul.f32 0.5, %v644_v1  ;;  %v661_v8 = vmul.f32 %v1406_v60, %v1406_v60  ;;  %v714_v54 = vld [vmem:[%s1507_s3 + $0x8] sm:$0xff]  ;;  %v683_v1 = vld [vmem:[%s1506_s2 + $0x10] sm:$0xff] }
 0x192   :  { %v556_v6 = vpop.xlane.xlu1 %555  ;;  %v645_v7 = vld [vmem:[#allocation4 + $0x20] sm:$0xff]  ;;  %v691_v11 = vadd.f32 1e-05, %v675_v63 }
 0x193   :  { %620 = vst.msk [vmem:[#allocation4 + $0x30] sm:$0xff] %vm22_vm0, %v612_v2  ;;  %v564_v10 = vadd.f32 %v556_v6, %v540_v62  ;;  %v668_v12 = vsub.f32 %v652_v3, %v660_v4  ;;  %v653_v13 = vmul.f32 0.5, %v645_v7  ;;  %v684_v2 = vld [vmem:[%s1506_s2 + $0x18] sm:$0xff] }
 0x194   :  { %v630_v15 = vld [vmem:[#allocation3 + $0x28] sm:$0xff]  ;;  %1141 = vrsqrt.f32 %v691_v11 }
 0x195   :  { %573 = vst.msk [vmem:[#allocation3 + $0x38] sm:$0xff] %vm22_vm0, %v564_v10  ;;  %v676_v16 = vmax.f32 %v668_v12, 0.0  ;;  %v1415_v17 = vmul.f32 0.5, %v630_v15  ;;  %v669_v21 = vsub.f32 %v653_v13, %v661_v8  ;;  %v716_v10 = vld [vmem:[%s1507_s3 + $0x18] sm:$0xff]  ;;  %v715_v15 = vld [vmem:[%s1507_s3 + $0x10] sm:$0xff] }
 0x196   :  { %v605_v18 = vpop.xlane.xlu1 %604  ;;  %v631_v26 = vld [vmem:[#allocation3 + $0x30] sm:$0xff] }
 0x197   :  { %v613_v22 = vadd.f32 %v605_v18, %v581_v14  ;;  %v692_v23 = vadd.f32 1e-05, %v676_v16  ;;  %v662_v25 = vmul.f32 %v1415_v17, %v1415_v17  ;;  %v677_v32 = vmax.f32 %v669_v21, 0.0  ;;  %v686_v16 = vld [vmem:[%s1506_s2 + $0x28] sm:$0xff] }
 0x198   :  { %v1138_v27 = vpop.eup %1137  ;;  %v646_v29 = vld [vmem:[#allocation4 + $0x28] sm:$0xff]  ;;  %v1423_v34 = vmul.f32 0.5, %v631_v26 }
 0x199   :  { %621 = vst.msk [vmem:[#allocation4 + $0x38] sm:$0xff] %vm22_vm0, %v613_v22  ;;  %v705_v30 = vmul.f32 %v1138_v27, %v681_v19  ;;  %1143 = vrsqrt.f32 %v692_v23  ;;  %v654_v31 = vmul.f32 0.5, %v646_v29  ;;  %v693_v45 = vadd.f32 1e-05, %v677_v32  ;;  %v688_v27 = vld [vmem:[%s1506_s2 + $0x38] sm:$0xff] }
 0x19a   :  { %v647_v39 = vld [vmem:[#allocation4 + $0x30] sm:$0xff]  ;;  %v663_v46 = vmul.f32 %v1423_v34, %v1423_v34  ;;  %v720_v32 = vld [vmem:[%s1507_s3 + $0x38] sm:$0xff] }
 0x19b   :  { %747 = vperm.xlu0 %1079, %v705_v30   ;;  %v670_v35 = vsub.f32 %v654_v31, %v662_v25  ;;  %v721_v44 = vmul.f32 %v705_v30, %v1384_v5  ;;  %v655_v51 = vmul.f32 0.5, %v647_v39 }
 0x19c   :  { %v632_v38 = vld [vmem:[#allocation3 + $0x38] sm:$0xff] }
 0x19d   :  { %v678_v41 = vmax.f32 %v670_v35, 0.0  ;;  %v1428_v42 = vmul.f32 0.5, %v632_v38  ;;  %v729_v58 = vsub.f32 %v713_v53, %v721_v44  ;;  %v671_v62 = vsub.f32 %v655_v51, %v663_v46  ;;  %v719_v44 = vld [vmem:[%s1507_s3 + $0x30] sm:$0xff] }
 0x19e   :  { %v1140_v43 = vpop.eup %1139 }
 0x19f   :  { %v706_v48 = vmul.f32 %v1140_v43, %v682_v36  ;;  %v694_v49 = vadd.f32 1e-05, %v678_v41  ;;  %v664_v50 = vmul.f32 %v1428_v42, %v1428_v42  ;;  %v679_v8 = vmax.f32 %v671_v62, 0.0  ;;  %v687_v41 = vld [vmem:[%s1506_s2 + $0x30] sm:$0xff] }
 0x1a0   :  { %v648_v55 = vld [vmem:[#allocation4 + $0x38] sm:$0xff] }
 0x1a1   :  { %752 = vperm.xlu1 %1080, %v706_v48   ;;  %v722_v5 = vmul.f32 %v706_v48, %v1392_v28  ;;  %1145 = vrsqrt.f32 %v694_v49  ;;  %v656_v56 = vmul.f32 0.5, %v648_v55  ;;  %v1142_v63 = vpop.eup %1141  ;;  %v695_v14 = vadd.f32 1e-05, %v679_v8 }
 0x1a2   :  { %1147 = vrsqrt.f32 %v693_v45  ;;  %v707_v4 = vmul.f32 %v1142_v63, %v683_v1 }
 0x1a3   :  { %v730_v59 = vsub.f32 %v714_v54, %v722_v5  ;;  %v672_v61 = vsub.f32 %v656_v56, %v664_v50 }
 0x1a4   :  { %v723_v13 = vmul.f32 %v707_v4, %v1397_v37  ;;  %v718_v37 = vld [vmem:[%s1507_s3 + $0x28] sm:$0xff] }
 0x1a5   :  { %795 = vperm.xlu1 %1080, %v729_v58   ;;  %800 = vperm.xlu0 %1079, %v730_v59   ;;  %v680_v3 = vmax.f32 %v672_v61, 0.0 }
 0x1a6   :  { %v1144_v28 = vpop.eup %1143  ;;  %v731_v21 = vsub.f32 %v715_v15, %v723_v13 }
 0x1a7   :  { %v708_v6 = vmul.f32 %v1144_v28, %v684_v2  ;;  %v696_v7 = vadd.f32 1e-05, %v680_v3 }
 0x1a9   :  { %757 = vperm.xlu1 %1080, %v707_v4   ;;  %v724_v11 = vmul.f32 %v708_v6, %v1403_v52  ;;  %1149 = vrsqrt.f32 %v696_v7  ;;  %v685_v52 = vld [vmem:[%s1506_s2 + $0x20] sm:$0xff] }
 0x1aa   :  { %1151 = vrsqrt.f32 %v695_v14 }
 0x1ab   :  { %v732_v12 = vsub.f32 %v716_v10, %v724_v11 }
 0x1ad   :  { %810 = vperm.xlu0 %1079, %v732_v12   ;;  %762 = vperm.xlu1 %1080, %v708_v6  }
 0x1ae   :  { %v1146_v18 = vpop.eup %1145 }
 0x1af   :  { %v1148_v19 = vpop.eup %1147  ;;  %v710_v22 = vmul.f32 %v1146_v18, %v686_v16 }
 0x1b0   :  { %v709_v26 = vmul.f32 %v1148_v19, %v685_v52 }
 0x1b1   :  { %805 = vperm.xlu1 %1080, %v731_v21   ;;  %v726_v23 = vmul.f32 %v710_v22, %v1415_v17  ;;  %v717_v17 = vld [vmem:[%s1507_s3 + $0x20] sm:$0xff] }
 0x1b2   :  { %v725_v31 = vmul.f32 %v709_v26, %v1406_v60 }
 0x1b3   :  { %v734_v25 = vsub.f32 %v718_v37, %v726_v23 }
 0x1b4   :  { %v733_v38 = vsub.f32 %v717_v17, %v725_v31 }
 0x1b5   :  { %820 = vperm.xlu0 %1079, %v734_v25   ;;  %767 = vperm.xlu1 %1080, %v709_v26  }
 0x1b6   :  { %v1150_v29 = vpop.eup %1149 }
 0x1b7   :  { %v712_v30 = vmul.f32 %v1150_v29, %v688_v27  ;;  %v1152_v39 = vpop.eup %1151 }
 0x1b8   :  { %v711_v60 = vmul.f32 %v1152_v39, %v687_v41 }
 0x1b9   :  { %772 = vperm.xlu1 %1080, %v710_v22   ;;  %v728_v35 = vmul.f32 %v712_v30, %v1428_v42 }
 0x1ba   :  { %v727_v43 = vmul.f32 %v711_v60, %v1423_v34 }
 0x1bb   :  { %v736_v36 = vsub.f32 %v720_v32, %v728_v35 }
 0x1bc   :  { %v735_v45 = vsub.f32 %v719_v44, %v727_v43 }
 0x1bd   :  { %830 = vperm.xlu0 %1079, %v736_v36   ;;  %815 = vperm.xlu1 %1080, %v733_v38  }
 0x1c1   :  { %777 = vperm.xlu1 %1080, %v711_v60  }
 0x1c5   :  { %782 = vperm.xlu1 %1080, %v712_v30  }
 0x1c9   :  { %825 = vperm.xlu1 %1080, %v735_v45  }
 0x216   :  { %v748_v42 = vpop.permute.xlu0 %747 }
 0x217   :  { %v785_v48 = vmul.f32 %v748_v42, %v1340_v57 }
 0x21c   :  { %v753_v46 = vpop.permute.xlu1 %752 }
 0x21d   :  { %v786_v49 = vmul.f32 %v753_v46, %v1343_v0 }
 0x220   :  { %v796_v50 = vpop.permute.xlu1 %795  ;;  %v801_v51 = vpop.permute.xlu0 %800 }
 0x221   :  { %v833_v53 = vadd.f32 %v796_v50, %v785_v48  ;;  %v834_v54 = vadd.f32 %v801_v51, %v786_v49 }
 0x223   :  { %vm841_vm1 = vcmp.ge.f32.partialorder %v833_v53, 0.0  ;;  %v849_v55 = vmul.f32 0.2, %v833_v53  ;;  %vm842_vm2 = vcmp.ge.f32.partialorder %v834_v54, 0.0  ;;  %v850_v34 = vmul.f32 0.2, %v834_v54 }
 0x224   :  { %v758_v5 = vpop.permute.xlu1 %757 }
 0x225   :  { %v857_v56 = vsel %vm841_vm1, %v833_v53, %v849_v55  ;;  %v858_v58 = vsel %vm842_vm2, %v834_v54, %v850_v34  ;;  %v787_v62 = vmul.f32 %v758_v5, %v1349_v9 }
 0x226   :  { %v977_v59 = vpack.c.bf16 %v858_v58, %v857_v56 }
 0x228   :  { %978 = vst [vmem:[%s1508_s4] sm:$0xff] %v977_v59   ;;  %v763_v61 = vpop.permute.xlu1 %762  ;;  %v811_v0 = vpop.permute.xlu0 %810 }
 0x229   :  { %v788_v57 = vmul.f32 %v763_v61, %v1355_v20 }
 0x22b   :  { %v836_v63 = vadd.f32 %v811_v0, %v788_v57 }
 0x22c   :  { %v806_v1 = vpop.permute.xlu1 %805 }
 0x22d   :  { %v852_v2 = vmul.f32 0.2, %v836_v63  ;;  %v835_v3 = vadd.f32 %v806_v1, %v787_v62  ;;  %vm844_vm3 = vcmp.ge.f32.partialorder %v836_v63, 0.0 }
 0x22f   :  { %vm843_vm4 = vcmp.ge.f32.partialorder %v835_v3, 0.0  ;;  %v851_v28 = vmul.f32 0.2, %v835_v3  ;;  %v860_v6 = vsel %vm844_vm3, %v836_v63, %v852_v2 }
 0x230   :  { %v768_v4 = vpop.permute.xlu1 %767  ;;  %v821_v11 = vpop.permute.xlu0 %820 }
 0x231   :  { %v859_v7 = vsel %vm843_vm4, %v835_v3, %v851_v28  ;;  %v789_v9 = vmul.f32 %v768_v4, %v1357_v24 }
 0x232   :  { %v982_v8 = vpack.c.bf16 %v860_v6, %v859_v7 }
 0x234   :  { %994 = vst [vmem:[%s1508_s4 + $0x8] sm:$0xff] %v982_v8   ;;  %v773_v10 = vpop.permute.xlu1 %772 }
 0x235   :  { %v790_v20 = vmul.f32 %v773_v10, %v1365_v33 }
 0x237   :  { %v838_v12 = vadd.f32 %v821_v11, %v790_v20 }
 0x238   :  { %v816_v13 = vpop.permute.xlu1 %815  ;;  %v831_v52 = vpop.permute.xlu0 %830 }
 0x239   :  { %v854_v14 = vmul.f32 0.2, %v838_v12  ;;  %v837_v15 = vadd.f32 %v816_v13, %v789_v9  ;;  %vm846_vm5 = vcmp.ge.f32.partialorder %v838_v12, 0.0 }
 0x23b   :  { %vm845_vm6 = vcmp.ge.f32.partialorder %v837_v15, 0.0  ;;  %v853_v16 = vmul.f32 0.2, %v837_v15  ;;  %v862_v21 = vsel %vm846_vm5, %v838_v12, %v854_v14 }
 0x23c   :  { %v778_v18 = vpop.permute.xlu1 %777 }
 0x23d   :  { %v861_v19 = vsel %vm845_vm6, %v837_v15, %v853_v16  ;;  %v791_v24 = vmul.f32 %v778_v18, %v1367_v40 }
 0x23e   :  { %v987_v22 = vpack.c.bf16 %v862_v21, %v861_v19 }
 0x240   :  { %995 = vst [vmem:[%s1508_s4 + $0x10] sm:$0xff] %v987_v22   ;;  %v783_v37 = vpop.permute.xlu1 %782 }
 0x241   :  { %v792_v33 = vmul.f32 %v783_v37, %v1375_v47 }
 0x243   :  { %v840_v23 = vadd.f32 %v831_v52, %v792_v33 }
 0x244   :  { %v826_v25 = vpop.permute.xlu1 %825 }
 0x245   :  { %v856_v26 = vmul.f32 0.2, %v840_v23  ;;  %v839_v27 = vadd.f32 %v826_v25, %v791_v24  ;;  %vm848_vm7 = vcmp.ge.f32.partialorder %v840_v23, 0.0 }
 0x247   :  { %vm847_vm8 = vcmp.ge.f32.partialorder %v839_v27, 0.0  ;;  %v855_v29 = vmul.f32 0.2, %v839_v27  ;;  %v864_v31 = vsel %vm848_vm7, %v840_v23, %v856_v26 }
 0x249   :  { %v863_v30 = vsel %vm847_vm8, %v839_v27, %v855_v29 }
 0x24a   :  { %v992_v32 = vpack.c.bf16 %v864_v31, %v863_v30 }
 0x24c   :  { %996 = vst [vmem:[%s1508_s4 + $0x18] sm:$0xff] %v992_v32  }

</bundles_post_ra>
